<compile_context>
chip_gen: v7x
topology: tpu7x:2x2x1
jax: 0.10.0
libtpu: 0.0.40
codegen_flags: <defaults>
</compile_context>

<pallas_src>
import functools

import jax
import jax.numpy as jnp
from jax import lax
from jax.experimental import pallas as pl
from jax.experimental.pallas import tpu as pltpu

EPS = 1e-5  # nn.BatchNorm2d default eps


def _round_up(x, m):
    return (x + m - 1) // m * m


# ------------------------------- Pallas kernel ------------------------------- #

def _fused_preact_block_kernel(xph_ref, wa_ref, wb_ref, scale_ref, bias_ref,
                               mask_ref, o_ref, panel_a, stage, panel_b, *,
                               stride, OH, Wp, Cin, Pa, B, Lb,
                               increase_dim, last_relu):
    """conv_a -> BN(scale,bias) -> ReLU -> conv_b -> +residual (-> ReLU), fused.

    xph_ref   : (B, s*s, Cin, Lx) phase-decomposed, flattened, zero-padded input (f32)
    wa_ref    : (Pa, 9*Cin) bf16   conv_a weights, tap-major along K
    wb_ref    : (Pa, 9*Pa)  bf16   conv_b weights, tap-major along K
    scale_ref : (Pa, 1) f32        folded BN scale
    bias_ref  : (Pa, 1) f32        folded BN bias
    mask_ref  : (1, B*Mp) f32      1.0 on valid output columns, 0.0 on junk columns
    o_ref     : (B, Pa, Mp)        channels-major output (Mp = OH*Wp, junk-extended)
    panel_a   : VMEM (9*Cin, B*Mp) bf16  im2col panel for conv_a
    stage     : VMEM (B, Pa, Lb)   bf16  y1 staged flat with implicit zero halo
    panel_b   : VMEM (9*Pa, B*Mp)  bf16  im2col panel for conv_b
    """
    s = stride
    Mp = OH * Wp

    # ---- conv_a: build the im2col panel in VMEM (9 shifted lane-slices per image),
    #      then a single large-K bf16 matmul on the MXU.
    for b in range(B):
        for kh in range(3):
            for kw in range(3):
                t = kh * 3 + kw
                ph = (kh % s) * s + (kw % s)
                off = (kh // s) * Wp + (kw // s)
                slab = xph_ref[b, ph, :, off:off + Mp]            # (Cin, Mp) f32
                panel_a[t * Cin:(t + 1) * Cin, b * Mp:(b + 1) * Mp] = (
                    slab.astype(jnp.bfloat16))

    z1 = jnp.dot(wa_ref[...], panel_a[...],
                 preferred_element_type=jnp.float32)              # (Pa, B*Mp) f32

    # ---- folded BN + ReLU, then zero the junk columns (required: they become the
    #      left/right zero-pad of y1 in the flat halo layout below).
    y1 = jnp.maximum(z1 * scale_ref[...] + bias_ref[...], 0.0)
    y1 = (y1 * mask_ref[...]).astype(jnp.bfloat16)

    # ---- stage y1 flat with an implicit zero halo: [Wp+1 zeros | y1 | Wp+1 zeros].
    #      Only the thin zero strips are written in addition to the interior; the
    #      interior is fully overwritten every step, so this is cross-step safe.
    for b in range(B):
        stage[b, :, 0:Wp + 1] = jnp.zeros((Pa, Wp + 1), jnp.bfloat16)
        stage[b, :, Wp + 1:Wp + 1 + Mp] = y1[:, b * Mp:(b + 1) * Mp]
        stage[b, :, Wp + 1 + Mp:Lb] = jnp.zeros((Pa, Lb - Wp - 1 - Mp), jnp.bfloat16)

    # ---- conv_b: same flat-slab panel trick on the VMEM-resident intermediate.
    for b in range(B):
        for kh in range(3):
            for kw in range(3):
                t = kh * 3 + kw
                off = kh * Wp + kw
                panel_b[t * Pa:(t + 1) * Pa, b * Mp:(b + 1) * Mp] = (
                    stage[b, :, off:off + Mp])

    z2 = jnp.dot(wb_ref[...], panel_b[...],
                 preferred_element_type=jnp.float32)              # (Pa, B*Mp) f32

    # ---- residual taken straight from the VMEM-resident input (f32, no extra HBM read).
    if increase_dim:
        res_ph, res_off = s * 1 + 1, 0       # x[:, ::2, ::2] == phase (1,1), offset 0
    else:
        res_ph, res_off = 0, Wp + 1          # identity residual (center of padded grid)

    for b in range(B):
        z2_b = z2[:, b * Mp:(b + 1) * Mp]                         # (Pa, Mp)
        res = xph_ref[b, res_ph, :, res_off:res_off + Mp].astype(jnp.float32)
        if increase_dim:
            # channel zero-pad: only the first Cin output channels get the residual.
            top = z2_b[:Cin, :] + res
            bot = z2_b[Cin:, :]
            if last_relu:
                top = jnp.maximum(top, 0.0)
                bot = jnp.maximum(bot, 0.0)
            o_ref[b, 0:Cin, :] = top.astype(o_ref.dtype)
            o_ref[b, Cin:Pa, :] = bot.astype(o_ref.dtype)
        else:
            y2 = z2_b + res
            if last_relu:
                y2 = jnp.maximum(y2, 0.0)
            o_ref[b, :, :] = y2.astype(o_ref.dtype)


# --------------------------------- module ------------------------------------ #

class PreActResidualBlockPallas:
    expansion = 1

    def __init__(self, inplanes, increase_dim=False, last_relu=False, *, key):
        self.increase_dim = increase_dim
        self.last_relu = last_relu
        if increase_dim:
            self.first_stride = 2
            planes = inplanes * 2
        else:
            self.first_stride = 1
            planes = inplanes
        self.inplanes = inplanes
        self.planes = planes

        k = jax.random.split(key, 6)
        # conv weights (OIHW, bias=False), deterministic synthetic init
        self.w_a = 0.1 * jax.random.normal(k[0], (planes, inplanes, 3, 3), jnp.float32)
        self.w_b = 0.1 * jax.random.normal(k[1], (planes, planes, 3, 3), jnp.float32)
        # bn_b parameters + running stats (inference-mode BN)
        self.gamma = 1.0 + 0.1 * jax.random.normal(k[2], (planes,), jnp.float32)
        self.beta = 0.1 * jax.random.normal(k[3], (planes,), jnp.float32)
        self.mean = 0.1 * jax.random.normal(k[4], (planes,), jnp.float32)
        self.var = jnp.abs(jax.random.normal(k[5], (planes,), jnp.float32)) + 0.5
        # bn_a parameters exist in the torch module but are dead code in forward().

    def __call__(self, x_nchw, images_per_step=4):
        N, Cin, H, W = x_nchw.shape
        s = self.first_stride
        Pa = self.planes
        OH = (H + 2 - 3) // s + 1
        OW = (W + 2 - 3) // s + 1
        ktaps = -(-3 // s)                    # cdiv(3, s): taps per phase row/col
        Hp = OH + ktaps - 1                   # per-phase padded row count
        Wp = OW + 2                           # junk-extended row width (flat layout)
        Mp = OH * Wp                          # per-image flattened output size
        Lx = _round_up(Hp * Wp + 2, 128)      # per-phase flat length (+ tap-window slack)
        Lb = Mp + 2 * (Wp + 1)                # staged y1: [zeros | y1 | zeros]

        # images per grid step (folded into the matmul M dim); must divide N.
        B = max(1, min(images_per_step, N))
        while N % B:
            B -= 1

        # Spatial zero pad (1 left/top, enough right/bottom for the phase grid), then
        # phase-decompose with channels on sublanes and flattened spatial on lanes.
        # For stride 1 the transpose is a no-op reshape.
        xpad = jnp.pad(x_nchw, ((0, 0), (0, 0),
                                (1, s * Hp - H - 1), (1, s * Wp - W - 1)))
        xph = xpad.reshape(N, Cin, Hp, s, Wp, s)
        xph = jnp.transpose(xph, (0, 3, 5, 1, 2, 4)).reshape(N, s * s, Cin, Hp * Wp)
        xph = jnp.pad(xph, ((0, 0), (0, 0), (0, 0), (0, Lx - Hp * Wp)))

        # Conv weights OIHW -> (Pa, 9*C) tap-major along K, bf16 for the MXU.
        wa = jnp.transpose(self.w_a, (0, 2, 3, 1)).reshape(Pa, 9 * Cin).astype(jnp.bfloat16)
        wb = jnp.transpose(self.w_b, (0, 2, 3, 1)).reshape(Pa, 9 * Pa).astype(jnp.bfloat16)

        # Fold BatchNorm (inference) into per-channel scale/bias, column-vector shaped.
        inv = lax.rsqrt(self.var + EPS)
        scale = (self.gamma * inv)[:, None]                               # (Pa, 1)
        bias = (self.beta - self.mean * self.gamma * inv)[:, None]        # (Pa, 1)

        # Junk-column mask for the flat layout (1.0 on valid output columns).
        col = jnp.arange(Mp, dtype=jnp.int32) % Wp
        mask = jnp.tile((col < OW).astype(jnp.float32), B)[None, :]       # (1, B*Mp)

        kernel = functools.partial(
            _fused_preact_block_kernel, stride=s, OH=OH, Wp=Wp, Cin=Cin, Pa=Pa,
            B=B, Lb=Lb, increase_dim=self.increase_dim, last_relu=self.last_relu)

        out = pl.pallas_call(
            kernel,
            out_shape=jax.ShapeDtypeStruct((N, Pa, Mp), x_nchw.dtype),
            grid=(N // B,),
            in_specs=[
                pl.BlockSpec((B, s * s, Cin, Lx), lambda g: (g, 0, 0, 0)),
                pl.BlockSpec((Pa, 9 * Cin), lambda g: (0, 0)),
                pl.BlockSpec((Pa, 9 * Pa), lambda g: (0, 0)),
                pl.BlockSpec((Pa, 1), lambda g: (0, 0)),
                pl.BlockSpec((Pa, 1), lambda g: (0, 0)),
                pl.BlockSpec((1, B * Mp), lambda g: (0, 0)),
            ],
            out_specs=pl.BlockSpec((B, Pa, Mp), lambda g: (g, 0, 0)),
            scratch_shapes=[
                pltpu.VMEM((9 * Cin, B * Mp), jnp.bfloat16),   # conv_a im2col panel
                pltpu.VMEM((B, Pa, Lb), jnp.bfloat16),         # staged y1 (+zero halo)
                pltpu.VMEM((9 * Pa, B * Mp), jnp.bfloat16),    # conv_b im2col panel
            ],
            compiler_params=pltpu.CompilerParams(
                dimension_semantics=("parallel",),
                # well under v7x's 64 MiB physical VMEM; also fine on v5e/v6e.
                vmem_limit_bytes=32 * 1024 * 1024),
        )(xph, wa, wb, scale, bias, mask)

        # (N, Pa, OH*Wp) -> NCHW: free reshape + cheap slice dropping the junk columns.
        return out.reshape(N, Pa, OH, Wp)[:, :, :, :OW]


# ------------------------------ pure-JAX reference --------------------------- #

def reference_forward(block, x_nchw):
    dn = jax.lax.conv_dimension_numbers(x_nchw.shape, block.w_a.shape,
                                        ("NCHW", "OIHW", "NCHW"))
    y = jax.lax.conv_general_dilated(x_nchw, block.w_a,
                                     (block.first_stride, block.first_stride),
                                     ((1, 1), (1, 1)), dimension_numbers=dn)
    g = block.gamma[None, :, None, None]
    b = block.beta[None, :, None, None]
    m = block.mean[None, :, None, None]
    v = block.var[None, :, None, None]
    y = (y - m) / jnp.sqrt(v + EPS) * g + b
    y = jnp.maximum(y, 0.0)
    dn2 = jax.lax.conv_dimension_numbers(y.shape, block.w_b.shape,
                                         ("NCHW", "OIHW", "NCHW"))
    y = jax.lax.conv_general_dilated(y, block.w_b, (1, 1), ((1, 1), (1, 1)),
                                     dimension_numbers=dn2)
    xr = x_nchw
    if block.increase_dim:
        xr = xr[..., ::2, ::2]
        xr = jnp.concatenate([xr, jnp.zeros_like(xr)], axis=1)
    y = xr + y
    if block.last_relu:
        y = jnp.maximum(y, 0.0)
    return y


# ----------------------------------- main ------------------------------------ #

if __name__ == "__main__":
    key = jax.random.PRNGKey(0)
    kx, kp1, kp2 = jax.random.split(key, 3)
    x = jax.random.normal(kx, (2, 4, 16, 16), jnp.float32)  # NCHW

    configs = [
        dict(increase_dim=False, last_relu=True, key=kp1),
        dict(increase_dim=True, last_relu=False, key=kp2),
    ]
    for cfg in configs:
        block = PreActResidualBlockPallas(4, **cfg)
        out = jax.block_until_ready(block(x))
        ref = reference_forward(block, x)
        assert out.shape == ref.shape, (out.shape, ref.shape)
        err = float(jnp.max(jnp.abs(out - ref)))
        # bf16 MXU operands with f32 accumulation -> relaxed tolerance vs f32 reference.
        assert jnp.allclose(out, ref, atol=5e-2, rtol=5e-2), err

    print("KERNEL_OK")
</pallas_src>

<mosaic_0001>
module attributes {stable_mosaic.version = 11 : i64} {
  func.func @_fused_preact_block_kernel(%arg0: i32, %arg1: memref<2x1x4x384xf32, #tpu.memory_space<vmem>>, %arg2: memref<4x36xbf16, #tpu.memory_space<vmem>>, %arg3: memref<4x36xbf16, #tpu.memory_space<vmem>>, %arg4: memref<4x1xf32, #tpu.memory_space<vmem>>, %arg5: memref<4x1xf32, #tpu.memory_space<vmem>>, %arg6: memref<1x576xf32, #tpu.memory_space<vmem>>, %arg7: memref<2x4x288xf32, #tpu.memory_space<vmem>>, %arg8: memref<36x576xbf16, #tpu.memory_space<vmem>>, %arg9: memref<2x4x326xbf16, #tpu.memory_space<vmem>>, %arg10: memref<36x576xbf16, #tpu.memory_space<vmem>>) attributes {dimension_semantics = [#tpu.dimension_semantics<parallel>], iteration_bounds = array<i64: 1>, scalar_prefetch = 0 : i64, scratch_operands = 3 : i64, tpu.core_type = #tpu.core_type<tc>, window_params = [{transform_indices = @transform_0, window_bounds = array<i64: 2, 1, 4, 384>}, {pipeline_mode = #tpu.pipeline_mode<synchronous>, transform_indices = @transform_1, window_bounds = array<i64: 4, 36>}, {pipeline_mode = #tpu.pipeline_mode<synchronous>, transform_indices = @transform_2, window_bounds = array<i64: 4, 36>}, {pipeline_mode = #tpu.pipeline_mode<synchronous>, transform_indices = @transform_3, window_bounds = array<i64: 4, 1>}, {pipeline_mode = #tpu.pipeline_mode<synchronous>, transform_indices = @transform_4, window_bounds = array<i64: 4, 1>}, {pipeline_mode = #tpu.pipeline_mode<synchronous>, transform_indices = @transform_5, window_bounds = array<i64: 1, 576>}, {transform_indices = @transform_6, window_bounds = array<i64: 2, 4, 288>}]} {
    %c0 = arith.constant 0 : index
    %c0_0 = arith.constant 0 : index
    %c0_1 = arith.constant 0 : index
    %c0_2 = arith.constant 0 : index
    %0 = vector.load %arg1[%c0, %c0_0, %c0_1, %c0_2] : memref<2x1x4x384xf32, #tpu.memory_space<vmem>>, vector<1x1x4x288xf32>
    %1 = vector.shape_cast %0 : vector<1x1x4x288xf32> to vector<4x288xf32>
    %2 = arith.truncf %1 : vector<4x288xf32> to vector<4x288xbf16>
    %c0_3 = arith.constant 0 : index
    %c0_4 = arith.constant 0 : index
    %3 = vector.load %arg8[%c0_3, %c0_4] : memref<36x576xbf16, #tpu.memory_space<vmem>>, vector<4x288xbf16>
    tpu.vector_store %arg8[%c0_3, %c0_4], %2 {strides = array<i32>} : memref<36x576xbf16, #tpu.memory_space<vmem>>, vector<4x288xbf16>,
    %c0_5 = arith.constant 0 : index
    %c0_6 = arith.constant 0 : index
    %c0_7 = arith.constant 0 : index
    %c1 = arith.constant 1 : index
    %4 = vector.load %arg1[%c0_5, %c0_6, %c0_7, %c1] : memref<2x1x4x384xf32, #tpu.memory_space<vmem>>, vector<1x1x4x288xf32>
    %5 = vector.shape_cast %4 : vector<1x1x4x288xf32> to vector<4x288xf32>
    %6 = arith.truncf %5 : vector<4x288xf32> to vector<4x288xbf16>
    %c4 = arith.constant 4 : index
    %c0_8 = arith.constant 0 : index
    %7 = vector.load %arg8[%c4, %c0_8] : memref<36x576xbf16, #tpu.memory_space<vmem>>, vector<4x288xbf16>
    tpu.vector_store %arg8[%c4, %c0_8], %6 {strides = array<i32>} : memref<36x576xbf16, #tpu.memory_space<vmem>>, vector<4x288xbf16>,
    %c0_9 = arith.constant 0 : index
    %c0_10 = arith.constant 0 : index
    %c0_11 = arith.constant 0 : index
    %c2 = arith.constant 2 : index
    %8 = vector.load %arg1[%c0_9, %c0_10, %c0_11, %c2] : memref<2x1x4x384xf32, #tpu.memory_space<vmem>>, vector<1x1x4x288xf32>
    %9 = vector.shape_cast %8 : vector<1x1x4x288xf32> to vector<4x288xf32>
    %10 = arith.truncf %9 : vector<4x288xf32> to vector<4x288xbf16>
    %c8 = arith.constant 8 : index
    %c0_12 = arith.constant 0 : index
    %11 = vector.load %arg8[%c8, %c0_12] : memref<36x576xbf16, #tpu.memory_space<vmem>>, vector<4x288xbf16>
    tpu.vector_store %arg8[%c8, %c0_12], %10 {strides = array<i32>} : memref<36x576xbf16, #tpu.memory_space<vmem>>, vector<4x288xbf16>,
    %c0_13 = arith.constant 0 : index
    %c0_14 = arith.constant 0 : index
    %c0_15 = arith.constant 0 : index
    %c18 = arith.constant 18 : index
    %12 = vector.load %arg1[%c0_13, %c0_14, %c0_15, %c18] : memref<2x1x4x384xf32, #tpu.memory_space<vmem>>, vector<1x1x4x288xf32>
    %13 = vector.shape_cast %12 : vector<1x1x4x288xf32> to vector<4x288xf32>
    %14 = arith.truncf %13 : vector<4x288xf32> to vector<4x288xbf16>
    %c12 = arith.constant 12 : index
    %c0_16 = arith.constant 0 : index
    %15 = vector.load %arg8[%c12, %c0_16] : memref<36x576xbf16, #tpu.memory_space<vmem>>, vector<4x288xbf16>
    tpu.vector_store %arg8[%c12, %c0_16], %14 {strides = array<i32>} : memref<36x576xbf16, #tpu.memory_space<vmem>>, vector<4x288xbf16>,
    %c0_17 = arith.constant 0 : index
    %c0_18 = arith.constant 0 : index
    %c0_19 = arith.constant 0 : index
    %c19 = arith.constant 19 : index
    %16 = vector.load %arg1[%c0_17, %c0_18, %c0_19, %c19] : memref<2x1x4x384xf32, #tpu.memory_space<vmem>>, vector<1x1x4x288xf32>
    %17 = vector.shape_cast %16 : vector<1x1x4x288xf32> to vector<4x288xf32>
    %18 = arith.truncf %17 : vector<4x288xf32> to vector<4x288xbf16>
    %c16 = arith.constant 16 : index
    %c0_20 = arith.constant 0 : index
    %19 = vector.load %arg8[%c16, %c0_20] : memref<36x576xbf16, #tpu.memory_space<vmem>>, vector<4x288xbf16>
    tpu.vector_store %arg8[%c16, %c0_20], %18 {strides = array<i32>} : memref<36x576xbf16, #tpu.memory_space<vmem>>, vector<4x288xbf16>,
    %c0_21 = arith.constant 0 : index
    %c0_22 = arith.constant 0 : index
    %c0_23 = arith.constant 0 : index
    %c20 = arith.constant 20 : index
    %20 = vector.load %arg1[%c0_21, %c0_22, %c0_23, %c20] : memref<2x1x4x384xf32, #tpu.memory_space<vmem>>, vector<1x1x4x288xf32>
    %21 = vector.shape_cast %20 : vector<1x1x4x288xf32> to vector<4x288xf32>
    %22 = arith.truncf %21 : vector<4x288xf32> to vector<4x288xbf16>
    %c20_24 = arith.constant 20 : index
    %c0_25 = arith.constant 0 : index
    %23 = vector.load %arg8[%c20_24, %c0_25] : memref<36x576xbf16, #tpu.memory_space<vmem>>, vector<4x288xbf16>
    tpu.vector_store %arg8[%c20_24, %c0_25], %22 {strides = array<i32>} : memref<36x576xbf16, #tpu.memory_space<vmem>>, vector<4x288xbf16>,
    %c0_26 = arith.constant 0 : index
    %c0_27 = arith.constant 0 : index
    %c0_28 = arith.constant 0 : index
    %c36 = arith.constant 36 : index
    %24 = vector.load %arg1[%c0_26, %c0_27, %c0_28, %c36] : memref<2x1x4x384xf32, #tpu.memory_space<vmem>>, vector<1x1x4x288xf32>
    %25 = vector.shape_cast %24 : vector<1x1x4x288xf32> to vector<4x288xf32>
    %26 = arith.truncf %25 : vector<4x288xf32> to vector<4x288xbf16>
    %c24 = arith.constant 24 : index
    %c0_29 = arith.constant 0 : index
    %27 = vector.load %arg8[%c24, %c0_29] : memref<36x576xbf16, #tpu.memory_space<vmem>>, vector<4x288xbf16>
    tpu.vector_store %arg8[%c24, %c0_29], %26 {strides = array<i32>} : memref<36x576xbf16, #tpu.memory_space<vmem>>, vector<4x288xbf16>,
    %c0_30 = arith.constant 0 : index
    %c0_31 = arith.constant 0 : index
    %c0_32 = arith.constant 0 : index
    %c37 = arith.constant 37 : index
    %28 = vector.load %arg1[%c0_30, %c0_31, %c0_32, %c37] : memref<2x1x4x384xf32, #tpu.memory_space<vmem>>, vector<1x1x4x288xf32>
    %29 = vector.shape_cast %28 : vector<1x1x4x288xf32> to vector<4x288xf32>
    %30 = arith.truncf %29 : vector<4x288xf32> to vector<4x288xbf16>
    %c28 = arith.constant 28 : index
    %c0_33 = arith.constant 0 : index
    %31 = vector.load %arg8[%c28, %c0_33] : memref<36x576xbf16, #tpu.memory_space<vmem>>, vector<4x288xbf16>
    tpu.vector_store %arg8[%c28, %c0_33], %30 {strides = array<i32>} : memref<36x576xbf16, #tpu.memory_space<vmem>>, vector<4x288xbf16>,
    %c0_34 = arith.constant 0 : index
    %c0_35 = arith.constant 0 : index
    %c0_36 = arith.constant 0 : index
    %c38 = arith.constant 38 : index
    %32 = vector.load %arg1[%c0_34, %c0_35, %c0_36, %c38] : memref<2x1x4x384xf32, #tpu.memory_space<vmem>>, vector<1x1x4x288xf32>
    %33 = vector.shape_cast %32 : vector<1x1x4x288xf32> to vector<4x288xf32>
    %34 = arith.truncf %33 : vector<4x288xf32> to vector<4x288xbf16>
    %c32 = arith.constant 32 : index
    %c0_37 = arith.constant 0 : index
    %35 = vector.load %arg8[%c32, %c0_37] : memref<36x576xbf16, #tpu.memory_space<vmem>>, vector<4x288xbf16>
    tpu.vector_store %arg8[%c32, %c0_37], %34 {strides = array<i32>} : memref<36x576xbf16, #tpu.memory_space<vmem>>, vector<4x288xbf16>,
    %c1_38 = arith.constant 1 : index
    %c0_39 = arith.constant 0 : index
    %c0_40 = arith.constant 0 : index
    %c0_41 = arith.constant 0 : index
    %36 = vector.load %arg1[%c1_38, %c0_39, %c0_40, %c0_41] : memref<2x1x4x384xf32, #tpu.memory_space<vmem>>, vector<1x1x4x288xf32>
    %37 = vector.shape_cast %36 : vector<1x1x4x288xf32> to vector<4x288xf32>
    %38 = arith.truncf %37 : vector<4x288xf32> to vector<4x288xbf16>
    %c0_42 = arith.constant 0 : index
    %c288 = arith.constant 288 : index
    %39 = vector.load %arg8[%c0_42, %c288] : memref<36x576xbf16, #tpu.memory_space<vmem>>, vector<4x288xbf16>
    tpu.vector_store %arg8[%c0_42, %c288], %38 {strides = array<i32>} : memref<36x576xbf16, #tpu.memory_space<vmem>>, vector<4x288xbf16>,
    %c1_43 = arith.constant 1 : index
    %c0_44 = arith.constant 0 : index
    %c0_45 = arith.constant 0 : index
    %c1_46 = arith.constant 1 : index
    %40 = vector.load %arg1[%c1_43, %c0_44, %c0_45, %c1_46] : memref<2x1x4x384xf32, #tpu.memory_space<vmem>>, vector<1x1x4x288xf32>
    %41 = vector.shape_cast %40 : vector<1x1x4x288xf32> to vector<4x288xf32>
    %42 = arith.truncf %41 : vector<4x288xf32> to vector<4x288xbf16>
    %c4_47 = arith.constant 4 : index
    %c288_48 = arith.constant 288 : index
    %43 = vector.load %arg8[%c4_47, %c288_48] : memref<36x576xbf16, #tpu.memory_space<vmem>>, vector<4x288xbf16>
    tpu.vector_store %arg8[%c4_47, %c288_48], %42 {strides = array<i32>} : memref<36x576xbf16, #tpu.memory_space<vmem>>, vector<4x288xbf16>,
    %c1_49 = arith.constant 1 : index
    %c0_50 = arith.constant 0 : index
    %c0_51 = arith.constant 0 : index
    %c2_52 = arith.constant 2 : index
    %44 = vector.load %arg1[%c1_49, %c0_50, %c0_51, %c2_52] : memref<2x1x4x384xf32, #tpu.memory_space<vmem>>, vector<1x1x4x288xf32>
    %45 = vector.shape_cast %44 : vector<1x1x4x288xf32> to vector<4x288xf32>
    %46 = arith.truncf %45 : vector<4x288xf32> to vector<4x288xbf16>
    %c8_53 = arith.constant 8 : index
    %c288_54 = arith.constant 288 : index
    %47 = vector.load %arg8[%c8_53, %c288_54] : memref<36x576xbf16, #tpu.memory_space<vmem>>, vector<4x288xbf16>
    tpu.vector_store %arg8[%c8_53, %c288_54], %46 {strides = array<i32>} : memref<36x576xbf16, #tpu.memory_space<vmem>>, vector<4x288xbf16>,
    %c1_55 = arith.constant 1 : index
    %c0_56 = arith.constant 0 : index
    %c0_57 = arith.constant 0 : index
    %c18_58 = arith.constant 18 : index
    %48 = vector.load %arg1[%c1_55, %c0_56, %c0_57, %c18_58] : memref<2x1x4x384xf32, #tpu.memory_space<vmem>>, vector<1x1x4x288xf32>
    %49 = vector.shape_cast %48 : vector<1x1x4x288xf32> to vector<4x288xf32>
    %50 = arith.truncf %49 : vector<4x288xf32> to vector<4x288xbf16>
    %c12_59 = arith.constant 12 : index
    %c288_60 = arith.constant 288 : index
    %51 = vector.load %arg8[%c12_59, %c288_60] : memref<36x576xbf16, #tpu.memory_space<vmem>>, vector<4x288xbf16>
    tpu.vector_store %arg8[%c12_59, %c288_60], %50 {strides = array<i32>} : memref<36x576xbf16, #tpu.memory_space<vmem>>, vector<4x288xbf16>,
    %c1_61 = arith.constant 1 : index
    %c0_62 = arith.constant 0 : index
    %c0_63 = arith.constant 0 : index
    %c19_64 = arith.constant 19 : index
    %52 = vector.load %arg1[%c1_61, %c0_62, %c0_63, %c19_64] : memref<2x1x4x384xf32, #tpu.memory_space<vmem>>, vector<1x1x4x288xf32>
    %53 = vector.shape_cast %52 : vector<1x1x4x288xf32> to vector<4x288xf32>
    %54 = arith.truncf %53 : vector<4x288xf32> to vector<4x288xbf16>
    %c16_65 = arith.constant 16 : index
    %c288_66 = arith.constant 288 : index
    %55 = vector.load %arg8[%c16_65, %c288_66] : memref<36x576xbf16, #tpu.memory_space<vmem>>, vector<4x288xbf16>
    tpu.vector_store %arg8[%c16_65, %c288_66], %54 {strides = array<i32>} : memref<36x576xbf16, #tpu.memory_space<vmem>>, vector<4x288xbf16>,
    %c1_67 = arith.constant 1 : index
    %c0_68 = arith.constant 0 : index
    %c0_69 = arith.constant 0 : index
    %c20_70 = arith.constant 20 : index
    %56 = vector.load %arg1[%c1_67, %c0_68, %c0_69, %c20_70] : memref<2x1x4x384xf32, #tpu.memory_space<vmem>>, vector<1x1x4x288xf32>
    %57 = vector.shape_cast %56 : vector<1x1x4x288xf32> to vector<4x288xf32>
    %58 = arith.truncf %57 : vector<4x288xf32> to vector<4x288xbf16>
    %c20_71 = arith.constant 20 : index
    %c288_72 = arith.constant 288 : index
    %59 = vector.load %arg8[%c20_71, %c288_72] : memref<36x576xbf16, #tpu.memory_space<vmem>>, vector<4x288xbf16>
    tpu.vector_store %arg8[%c20_71, %c288_72], %58 {strides = array<i32>} : memref<36x576xbf16, #tpu.memory_space<vmem>>, vector<4x288xbf16>,
    %c1_73 = arith.constant 1 : index
    %c0_74 = arith.constant 0 : index
    %c0_75 = arith.constant 0 : index
    %c36_76 = arith.constant 36 : index
    %60 = vector.load %arg1[%c1_73, %c0_74, %c0_75, %c36_76] : memref<2x1x4x384xf32, #tpu.memory_space<vmem>>, vector<1x1x4x288xf32>
    %61 = vector.shape_cast %60 : vector<1x1x4x288xf32> to vector<4x288xf32>
    %62 = arith.truncf %61 : vector<4x288xf32> to vector<4x288xbf16>
    %c24_77 = arith.constant 24 : index
    %c288_78 = arith.constant 288 : index
    %63 = vector.load %arg8[%c24_77, %c288_78] : memref<36x576xbf16, #tpu.memory_space<vmem>>, vector<4x288xbf16>
    tpu.vector_store %arg8[%c24_77, %c288_78], %62 {strides = array<i32>} : memref<36x576xbf16, #tpu.memory_space<vmem>>, vector<4x288xbf16>,
    %c1_79 = arith.constant 1 : index
    %c0_80 = arith.constant 0 : index
    %c0_81 = arith.constant 0 : index
    %c37_82 = arith.constant 37 : index
    %64 = vector.load %arg1[%c1_79, %c0_80, %c0_81, %c37_82] : memref<2x1x4x384xf32, #tpu.memory_space<vmem>>, vector<1x1x4x288xf32>
    %65 = vector.shape_cast %64 : vector<1x1x4x288xf32> to vector<4x288xf32>
    %66 = arith.truncf %65 : vector<4x288xf32> to vector<4x288xbf16>
    %c28_83 = arith.constant 28 : index
    %c288_84 = arith.constant 288 : index
    %67 = vector.load %arg8[%c28_83, %c288_84] : memref<36x576xbf16, #tpu.memory_space<vmem>>, vector<4x288xbf16>
    tpu.vector_store %arg8[%c28_83, %c288_84], %66 {strides = array<i32>} : memref<36x576xbf16, #tpu.memory_space<vmem>>, vector<4x288xbf16>,
    %c1_85 = arith.constant 1 : index
    %c0_86 = arith.constant 0 : index
    %c0_87 = arith.constant 0 : index
    %c38_88 = arith.constant 38 : index
    %68 = vector.load %arg1[%c1_85, %c0_86, %c0_87, %c38_88] : memref<2x1x4x384xf32, #tpu.memory_space<vmem>>, vector<1x1x4x288xf32>
    %69 = vector.shape_cast %68 : vector<1x1x4x288xf32> to vector<4x288xf32>
    %70 = arith.truncf %69 : vector<4x288xf32> to vector<4x288xbf16>
    %c32_89 = arith.constant 32 : index
    %c288_90 = arith.constant 288 : index
    %71 = vector.load %arg8[%c32_89, %c288_90] : memref<36x576xbf16, #tpu.memory_space<vmem>>, vector<4x288xbf16>
    tpu.vector_store %arg8[%c32_89, %c288_90], %70 {strides = array<i32>} : memref<36x576xbf16, #tpu.memory_space<vmem>>, vector<4x288xbf16>,
    %c0_91 = arith.constant 0 : index
    %c0_92 = arith.constant 0 : index
    %72 = vector.load %arg2[%c0_91, %c0_92] : memref<4x36xbf16, #tpu.memory_space<vmem>>, vector<4x36xbf16>
    %c0_93 = arith.constant 0 : index
    %c0_94 = arith.constant 0 : index
    %73 = vector.load %arg8[%c0_93, %c0_94] : memref<36x576xbf16, #tpu.memory_space<vmem>>, vector<36x576xbf16>
    %cst = arith.constant dense<0.000000e+00> : vector<4x576xf32>
    %74 = tpu.matmul %72, %73, %cst {dimension_numbers = #tpu.dot_dimension_numbers<[1], [0], [0], [1], [0, 0, 1, 1], [], []>} : vector<4x36xbf16>, vector<36x576xbf16>, vector<4x576xf32> -> vector<4x576xf32>
    %c0_95 = arith.constant 0 : index
    %c0_96 = arith.constant 0 : index
    %75 = vector.load %arg4[%c0_95, %c0_96] : memref<4x1xf32, #tpu.memory_space<vmem>>, vector<4x1xf32>
    %76 = vector.broadcast %75 : vector<4x1xf32> to vector<4x576xf32>
    %77 = arith.mulf %74, %76 : vector<4x576xf32>
    %c0_97 = arith.constant 0 : index
    %c0_98 = arith.constant 0 : index
    %78 = vector.load %arg5[%c0_97, %c0_98] : memref<4x1xf32, #tpu.memory_space<vmem>>, vector<4x1xf32>
    %79 = vector.broadcast %78 : vector<4x1xf32> to vector<4x576xf32>
    %80 = arith.addf %77, %79 : vector<4x576xf32>
    %cst_99 = arith.constant 0.000000e+00 : f32
    %81 = vector.broadcast %cst_99 : f32 to vector<4x576xf32>
    %82 = arith.maximumf %80, %81 : vector<4x576xf32>
    %c0_100 = arith.constant 0 : index
    %c0_101 = arith.constant 0 : index
    %83 = vector.load %arg6[%c0_100, %c0_101] : memref<1x576xf32, #tpu.memory_space<vmem>>, vector<1x576xf32>
    %84 = vector.broadcast %83 : vector<1x576xf32> to vector<4x576xf32>
    %85 = arith.mulf %82, %84 : vector<4x576xf32>
    %86 = arith.truncf %85 : vector<4x576xf32> to vector<4x576xbf16>
    %cst_102 = arith.constant 0.000000e+00 : bf16
    %87 = vector.broadcast %cst_102 : bf16 to vector<4x19xbf16>
    %c0_103 = arith.constant 0 : index
    %c0_104 = arith.constant 0 : index
    %c0_105 = arith.constant 0 : index
    %88 = vector.load %arg9[%c0_103, %c0_104, %c0_105] : memref<2x4x326xbf16, #tpu.memory_space<vmem>>, vector<1x4x19xbf16>
    %89 = vector.shape_cast %88 : vector<1x4x19xbf16> to vector<4x19xbf16>
    %90 = vector.shape_cast %87 : vector<4x19xbf16> to vector<1x4x19xbf16>
    tpu.vector_store %arg9[%c0_103, %c0_104, %c0_105], %90 {strides = array<i32>} : memref<2x4x326xbf16, #tpu.memory_space<vmem>>, vector<1x4x19xbf16>,
    %91 = vector.extract_strided_slice %86 {offsets = [0, 0], sizes = [4, 288], strides = [1, 1]} : vector<4x576xbf16> to vector<4x288xbf16>
    %c0_106 = arith.constant 0 : index
    %c0_107 = arith.constant 0 : index
    %c19_108 = arith.constant 19 : index
    %92 = vector.load %arg9[%c0_106, %c0_107, %c19_108] : memref<2x4x326xbf16, #tpu.memory_space<vmem>>, vector<1x4x288xbf16>
    %93 = vector.shape_cast %92 : vector<1x4x288xbf16> to vector<4x288xbf16>
    %94 = vector.shape_cast %91 : vector<4x288xbf16> to vector<1x4x288xbf16>
    tpu.vector_store %arg9[%c0_106, %c0_107, %c19_108], %94 {strides = array<i32>} : memref<2x4x326xbf16, #tpu.memory_space<vmem>>, vector<1x4x288xbf16>,
    %cst_109 = arith.constant 0.000000e+00 : bf16
    %95 = vector.broadcast %cst_109 : bf16 to vector<4x19xbf16>
    %c0_110 = arith.constant 0 : index
    %c0_111 = arith.constant 0 : index
    %c307 = arith.constant 307 : index
    %96 = vector.load %arg9[%c0_110, %c0_111, %c307] : memref<2x4x326xbf16, #tpu.memory_space<vmem>>, vector<1x4x19xbf16>
    %97 = vector.shape_cast %96 : vector<1x4x19xbf16> to vector<4x19xbf16>
    %98 = vector.shape_cast %95 : vector<4x19xbf16> to vector<1x4x19xbf16>
    tpu.vector_store %arg9[%c0_110, %c0_111, %c307], %98 {strides = array<i32>} : memref<2x4x326xbf16, #tpu.memory_space<vmem>>, vector<1x4x19xbf16>,
    %cst_112 = arith.constant 0.000000e+00 : bf16
    %99 = vector.broadcast %cst_112 : bf16 to vector<4x19xbf16>
    %c1_113 = arith.constant 1 : index
    %c0_114 = arith.constant 0 : index
    %c0_115 = arith.constant 0 : index
    %100 = vector.load %arg9[%c1_113, %c0_114, %c0_115] : memref<2x4x326xbf16, #tpu.memory_space<vmem>>, vector<1x4x19xbf16>
    %101 = vector.shape_cast %100 : vector<1x4x19xbf16> to vector<4x19xbf16>
    %102 = vector.shape_cast %99 : vector<4x19xbf16> to vector<1x4x19xbf16>
    tpu.vector_store %arg9[%c1_113, %c0_114, %c0_115], %102 {strides = array<i32>} : memref<2x4x326xbf16, #tpu.memory_space<vmem>>, vector<1x4x19xbf16>,
    %103 = vector.extract_strided_slice %86 {offsets = [0, 288], sizes = [4, 288], strides = [1, 1]} : vector<4x576xbf16> to vector<4x288xbf16>
    %c1_116 = arith.constant 1 : index
    %c0_117 = arith.constant 0 : index
    %c19_118 = arith.constant 19 : index
    %104 = vector.load %arg9[%c1_116, %c0_117, %c19_118] : memref<2x4x326xbf16, #tpu.memory_space<vmem>>, vector<1x4x288xbf16>
    %105 = vector.shape_cast %104 : vector<1x4x288xbf16> to vector<4x288xbf16>
    %106 = vector.shape_cast %103 : vector<4x288xbf16> to vector<1x4x288xbf16>
    tpu.vector_store %arg9[%c1_116, %c0_117, %c19_118], %106 {strides = array<i32>} : memref<2x4x326xbf16, #tpu.memory_space<vmem>>, vector<1x4x288xbf16>,
    %cst_119 = arith.constant 0.000000e+00 : bf16
    %107 = vector.broadcast %cst_119 : bf16 to vector<4x19xbf16>
    %c1_120 = arith.constant 1 : index
    %c0_121 = arith.constant 0 : index
    %c307_122 = arith.constant 307 : index
    %108 = vector.load %arg9[%c1_120, %c0_121, %c307_122] : memref<2x4x326xbf16, #tpu.memory_space<vmem>>, vector<1x4x19xbf16>
    %109 = vector.shape_cast %108 : vector<1x4x19xbf16> to vector<4x19xbf16>
    %110 = vector.shape_cast %107 : vector<4x19xbf16> to vector<1x4x19xbf16>
    tpu.vector_store %arg9[%c1_120, %c0_121, %c307_122], %110 {strides = array<i32>} : memref<2x4x326xbf16, #tpu.memory_space<vmem>>, vector<1x4x19xbf16>,
    %c0_123 = arith.constant 0 : index
    %c0_124 = arith.constant 0 : index
    %c0_125 = arith.constant 0 : index
    %111 = vector.load %arg9[%c0_123, %c0_124, %c0_125] : memref<2x4x326xbf16, #tpu.memory_space<vmem>>, vector<1x4x288xbf16>
    %112 = vector.shape_cast %111 : vector<1x4x288xbf16> to vector<4x288xbf16>
    %c0_126 = arith.constant 0 : index
    %c0_127 = arith.constant 0 : index
    %113 = vector.load %arg10[%c0_126, %c0_127] : memref<36x576xbf16, #tpu.memory_space<vmem>>, vector<4x288xbf16>
    tpu.vector_store %arg10[%c0_126, %c0_127], %112 {strides = array<i32>} : memref<36x576xbf16, #tpu.memory_space<vmem>>, vector<4x288xbf16>,
    %c0_128 = arith.constant 0 : index
    %c0_129 = arith.constant 0 : index
    %c1_130 = arith.constant 1 : index
    %114 = vector.load %arg9[%c0_128, %c0_129, %c1_130] : memref<2x4x326xbf16, #tpu.memory_space<vmem>>, vector<1x4x288xbf16>
    %115 = vector.shape_cast %114 : vector<1x4x288xbf16> to vector<4x288xbf16>
    %c4_131 = arith.constant 4 : index
    %c0_132 = arith.constant 0 : index
    %116 = vector.load %arg10[%c4_131, %c0_132] : memref<36x576xbf16, #tpu.memory_space<vmem>>, vector<4x288xbf16>
    tpu.vector_store %arg10[%c4_131, %c0_132], %115 {strides = array<i32>} : memref<36x576xbf16, #tpu.memory_space<vmem>>, vector<4x288xbf16>,
    %c0_133 = arith.constant 0 : index
    %c0_134 = arith.constant 0 : index
    %c2_135 = arith.constant 2 : index
    %117 = vector.load %arg9[%c0_133, %c0_134, %c2_135] : memref<2x4x326xbf16, #tpu.memory_space<vmem>>, vector<1x4x288xbf16>
    %118 = vector.shape_cast %117 : vector<1x4x288xbf16> to vector<4x288xbf16>
    %c8_136 = arith.constant 8 : index
    %c0_137 = arith.constant 0 : index
    %119 = vector.load %arg10[%c8_136, %c0_137] : memref<36x576xbf16, #tpu.memory_space<vmem>>, vector<4x288xbf16>
    tpu.vector_store %arg10[%c8_136, %c0_137], %118 {strides = array<i32>} : memref<36x576xbf16, #tpu.memory_space<vmem>>, vector<4x288xbf16>,
    %c0_138 = arith.constant 0 : index
    %c0_139 = arith.constant 0 : index
    %c18_140 = arith.constant 18 : index
    %120 = vector.load %arg9[%c0_138, %c0_139, %c18_140] : memref<2x4x326xbf16, #tpu.memory_space<vmem>>, vector<1x4x288xbf16>
    %121 = vector.shape_cast %120 : vector<1x4x288xbf16> to vector<4x288xbf16>
    %c12_141 = arith.constant 12 : index
    %c0_142 = arith.constant 0 : index
    %122 = vector.load %arg10[%c12_141, %c0_142] : memref<36x576xbf16, #tpu.memory_space<vmem>>, vector<4x288xbf16>
    tpu.vector_store %arg10[%c12_141, %c0_142], %121 {strides = array<i32>} : memref<36x576xbf16, #tpu.memory_space<vmem>>, vector<4x288xbf16>,
    %c0_143 = arith.constant 0 : index
    %c0_144 = arith.constant 0 : index
    %c19_145 = arith.constant 19 : index
    %123 = vector.load %arg9[%c0_143, %c0_144, %c19_145] : memref<2x4x326xbf16, #tpu.memory_space<vmem>>, vector<1x4x288xbf16>
    %124 = vector.shape_cast %123 : vector<1x4x288xbf16> to vector<4x288xbf16>
    %c16_146 = arith.constant 16 : index
    %c0_147 = arith.constant 0 : index
    %125 = vector.load %arg10[%c16_146, %c0_147] : memref<36x576xbf16, #tpu.memory_space<vmem>>, vector<4x288xbf16>
    tpu.vector_store %arg10[%c16_146, %c0_147], %124 {strides = array<i32>} : memref<36x576xbf16, #tpu.memory_space<vmem>>, vector<4x288xbf16>,
    %c0_148 = arith.constant 0 : index
    %c0_149 = arith.constant 0 : index
    %c20_150 = arith.constant 20 : index
    %126 = vector.load %arg9[%c0_148, %c0_149, %c20_150] : memref<2x4x326xbf16, #tpu.memory_space<vmem>>, vector<1x4x288xbf16>
    %127 = vector.shape_cast %126 : vector<1x4x288xbf16> to vector<4x288xbf16>
    %c20_151 = arith.constant 20 : index
    %c0_152 = arith.constant 0 : index
    %128 = vector.load %arg10[%c20_151, %c0_152] : memref<36x576xbf16, #tpu.memory_space<vmem>>, vector<4x288xbf16>
    tpu.vector_store %arg10[%c20_151, %c0_152], %127 {strides = array<i32>} : memref<36x576xbf16, #tpu.memory_space<vmem>>, vector<4x288xbf16>,
    %c0_153 = arith.constant 0 : index
    %c0_154 = arith.constant 0 : index
    %c36_155 = arith.constant 36 : index
    %129 = vector.load %arg9[%c0_153, %c0_154, %c36_155] : memref<2x4x326xbf16, #tpu.memory_space<vmem>>, vector<1x4x288xbf16>
    %130 = vector.shape_cast %129 : vector<1x4x288xbf16> to vector<4x288xbf16>
    %c24_156 = arith.constant 24 : index
    %c0_157 = arith.constant 0 : index
    %131 = vector.load %arg10[%c24_156, %c0_157] : memref<36x576xbf16, #tpu.memory_space<vmem>>, vector<4x288xbf16>
    tpu.vector_store %arg10[%c24_156, %c0_157], %130 {strides = array<i32>} : memref<36x576xbf16, #tpu.memory_space<vmem>>, vector<4x288xbf16>,
    %c0_158 = arith.constant 0 : index
    %c0_159 = arith.constant 0 : index
    %c37_160 = arith.constant 37 : index
    %132 = vector.load %arg9[%c0_158, %c0_159, %c37_160] : memref<2x4x326xbf16, #tpu.memory_space<vmem>>, vector<1x4x288xbf16>
    %133 = vector.shape_cast %132 : vector<1x4x288xbf16> to vector<4x288xbf16>
    %c28_161 = arith.constant 28 : index
    %c0_162 = arith.constant 0 : index
    %134 = vector.load %arg10[%c28_161, %c0_162] : memref<36x576xbf16, #tpu.memory_space<vmem>>, vector<4x288xbf16>
    tpu.vector_store %arg10[%c28_161, %c0_162], %133 {strides = array<i32>} : memref<36x576xbf16, #tpu.memory_space<vmem>>, vector<4x288xbf16>,
    %c0_163 = arith.constant 0 : index
    %c0_164 = arith.constant 0 : index
    %c38_165 = arith.constant 38 : index
    %135 = vector.load %arg9[%c0_163, %c0_164, %c38_165] : memref<2x4x326xbf16, #tpu.memory_space<vmem>>, vector<1x4x288xbf16>
    %136 = vector.shape_cast %135 : vector<1x4x288xbf16> to vector<4x288xbf16>
    %c32_166 = arith.constant 32 : index
    %c0_167 = arith.constant 0 : index
    %137 = vector.load %arg10[%c32_166, %c0_167] : memref<36x576xbf16, #tpu.memory_space<vmem>>, vector<4x288xbf16>
    tpu.vector_store %arg10[%c32_166, %c0_167], %136 {strides = array<i32>} : memref<36x576xbf16, #tpu.memory_space<vmem>>, vector<4x288xbf16>,
    %c1_168 = arith.constant 1 : index
    %c0_169 = arith.constant 0 : index
    %c0_170 = arith.constant 0 : index
    %138 = vector.load %arg9[%c1_168, %c0_169, %c0_170] : memref<2x4x326xbf16, #tpu.memory_space<vmem>>, vector<1x4x288xbf16>
    %139 = vector.shape_cast %138 : vector<1x4x288xbf16> to vector<4x288xbf16>
    %c0_171 = arith.constant 0 : index
    %c288_172 = arith.constant 288 : index
    %140 = vector.load %arg10[%c0_171, %c288_172] : memref<36x576xbf16, #tpu.memory_space<vmem>>, vector<4x288xbf16>
    tpu.vector_store %arg10[%c0_171, %c288_172], %139 {strides = array<i32>} : memref<36x576xbf16, #tpu.memory_space<vmem>>, vector<4x288xbf16>,
    %c1_173 = arith.constant 1 : index
    %c0_174 = arith.constant 0 : index
    %c1_175 = arith.constant 1 : index
    %141 = vector.load %arg9[%c1_173, %c0_174, %c1_175] : memref<2x4x326xbf16, #tpu.memory_space<vmem>>, vector<1x4x288xbf16>
    %142 = vector.shape_cast %141 : vector<1x4x288xbf16> to vector<4x288xbf16>
    %c4_176 = arith.constant 4 : index
    %c288_177 = arith.constant 288 : index
    %143 = vector.load %arg10[%c4_176, %c288_177] : memref<36x576xbf16, #tpu.memory_space<vmem>>, vector<4x288xbf16>
    tpu.vector_store %arg10[%c4_176, %c288_177], %142 {strides = array<i32>} : memref<36x576xbf16, #tpu.memory_space<vmem>>, vector<4x288xbf16>,
    %c1_178 = arith.constant 1 : index
    %c0_179 = arith.constant 0 : index
    %c2_180 = arith.constant 2 : index
    %144 = vector.load %arg9[%c1_178, %c0_179, %c2_180] : memref<2x4x326xbf16, #tpu.memory_space<vmem>>, vector<1x4x288xbf16>
    %145 = vector.shape_cast %144 : vector<1x4x288xbf16> to vector<4x288xbf16>
    %c8_181 = arith.constant 8 : index
    %c288_182 = arith.constant 288 : index
    %146 = vector.load %arg10[%c8_181, %c288_182] : memref<36x576xbf16, #tpu.memory_space<vmem>>, vector<4x288xbf16>
    tpu.vector_store %arg10[%c8_181, %c288_182], %145 {strides = array<i32>} : memref<36x576xbf16, #tpu.memory_space<vmem>>, vector<4x288xbf16>,
    %c1_183 = arith.constant 1 : index
    %c0_184 = arith.constant 0 : index
    %c18_185 = arith.constant 18 : index
    %147 = vector.load %arg9[%c1_183, %c0_184, %c18_185] : memref<2x4x326xbf16, #tpu.memory_space<vmem>>, vector<1x4x288xbf16>
    %148 = vector.shape_cast %147 : vector<1x4x288xbf16> to vector<4x288xbf16>
    %c12_186 = arith.constant 12 : index
    %c288_187 = arith.constant 288 : index
    %149 = vector.load %arg10[%c12_186, %c288_187] : memref<36x576xbf16, #tpu.memory_space<vmem>>, vector<4x288xbf16>
    tpu.vector_store %arg10[%c12_186, %c288_187], %148 {strides = array<i32>} : memref<36x576xbf16, #tpu.memory_space<vmem>>, vector<4x288xbf16>,
    %c1_188 = arith.constant 1 : index
    %c0_189 = arith.constant 0 : index
    %c19_190 = arith.constant 19 : index
    %150 = vector.load %arg9[%c1_188, %c0_189, %c19_190] : memref<2x4x326xbf16, #tpu.memory_space<vmem>>, vector<1x4x288xbf16>
    %151 = vector.shape_cast %150 : vector<1x4x288xbf16> to vector<4x288xbf16>
    %c16_191 = arith.constant 16 : index
    %c288_192 = arith.constant 288 : index
    %152 = vector.load %arg10[%c16_191, %c288_192] : memref<36x576xbf16, #tpu.memory_space<vmem>>, vector<4x288xbf16>
    tpu.vector_store %arg10[%c16_191, %c288_192], %151 {strides = array<i32>} : memref<36x576xbf16, #tpu.memory_space<vmem>>, vector<4x288xbf16>,
    %c1_193 = arith.constant 1 : index
    %c0_194 = arith.constant 0 : index
    %c20_195 = arith.constant 20 : index
    %153 = vector.load %arg9[%c1_193, %c0_194, %c20_195] : memref<2x4x326xbf16, #tpu.memory_space<vmem>>, vector<1x4x288xbf16>
    %154 = vector.shape_cast %153 : vector<1x4x288xbf16> to vector<4x288xbf16>
    %c20_196 = arith.constant 20 : index
    %c288_197 = arith.constant 288 : index
    %155 = vector.load %arg10[%c20_196, %c288_197] : memref<36x576xbf16, #tpu.memory_space<vmem>>, vector<4x288xbf16>
    tpu.vector_store %arg10[%c20_196, %c288_197], %154 {strides = array<i32>} : memref<36x576xbf16, #tpu.memory_space<vmem>>, vector<4x288xbf16>,
    %c1_198 = arith.constant 1 : index
    %c0_199 = arith.constant 0 : index
    %c36_200 = arith.constant 36 : index
    %156 = vector.load %arg9[%c1_198, %c0_199, %c36_200] : memref<2x4x326xbf16, #tpu.memory_space<vmem>>, vector<1x4x288xbf16>
    %157 = vector.shape_cast %156 : vector<1x4x288xbf16> to vector<4x288xbf16>
    %c24_201 = arith.constant 24 : index
    %c288_202 = arith.constant 288 : index
    %158 = vector.load %arg10[%c24_201, %c288_202] : memref<36x576xbf16, #tpu.memory_space<vmem>>, vector<4x288xbf16>
    tpu.vector_store %arg10[%c24_201, %c288_202], %157 {strides = array<i32>} : memref<36x576xbf16, #tpu.memory_space<vmem>>, vector<4x288xbf16>,
    %c1_203 = arith.constant 1 : index
    %c0_204 = arith.constant 0 : index
    %c37_205 = arith.constant 37 : index
    %159 = vector.load %arg9[%c1_203, %c0_204, %c37_205] : memref<2x4x326xbf16, #tpu.memory_space<vmem>>, vector<1x4x288xbf16>
    %160 = vector.shape_cast %159 : vector<1x4x288xbf16> to vector<4x288xbf16>
    %c28_206 = arith.constant 28 : index
    %c288_207 = arith.constant 288 : index
    %161 = vector.load %arg10[%c28_206, %c288_207] : memref<36x576xbf16, #tpu.memory_space<vmem>>, vector<4x288xbf16>
    tpu.vector_store %arg10[%c28_206, %c288_207], %160 {strides = array<i32>} : memref<36x576xbf16, #tpu.memory_space<vmem>>, vector<4x288xbf16>,
    %c1_208 = arith.constant 1 : index
    %c0_209 = arith.constant 0 : index
    %c38_210 = arith.constant 38 : index
    %162 = vector.load %arg9[%c1_208, %c0_209, %c38_210] : memref<2x4x326xbf16, #tpu.memory_space<vmem>>, vector<1x4x288xbf16>
    %163 = vector.shape_cast %162 : vector<1x4x288xbf16> to vector<4x288xbf16>
    %c32_211 = arith.constant 32 : index
    %c288_212 = arith.constant 288 : index
    %164 = vector.load %arg10[%c32_211, %c288_212] : memref<36x576xbf16, #tpu.memory_space<vmem>>, vector<4x288xbf16>
    tpu.vector_store %arg10[%c32_211, %c288_212], %163 {strides = array<i32>} : memref<36x576xbf16, #tpu.memory_space<vmem>>, vector<4x288xbf16>,
    %c0_213 = arith.constant 0 : index
    %c0_214 = arith.constant 0 : index
    %165 = vector.load %arg3[%c0_213, %c0_214] : memref<4x36xbf16, #tpu.memory_space<vmem>>, vector<4x36xbf16>
    %c0_215 = arith.constant 0 : index
    %c0_216 = arith.constant 0 : index
    %166 = vector.load %arg10[%c0_215, %c0_216] : memref<36x576xbf16, #tpu.memory_space<vmem>>, vector<36x576xbf16>
    %cst_217 = arith.constant dense<0.000000e+00> : vector<4x576xf32>
    %167 = tpu.matmul %165, %166, %cst_217 {dimension_numbers = #tpu.dot_dimension_numbers<[1], [0], [0], [1], [0, 0, 1, 1], [], []>} : vector<4x36xbf16>, vector<36x576xbf16>, vector<4x576xf32> -> vector<4x576xf32>
    %168 = vector.extract_strided_slice %167 {offsets = [0, 0], sizes = [4, 288], strides = [1, 1]} : vector<4x576xf32> to vector<4x288xf32>
    %c0_218 = arith.constant 0 : index
    %c0_219 = arith.constant 0 : index
    %c0_220 = arith.constant 0 : index
    %c19_221 = arith.constant 19 : index
    %169 = vector.load %arg1[%c0_218, %c0_219, %c0_220, %c19_221] : memref<2x1x4x384xf32, #tpu.memory_space<vmem>>, vector<1x1x4x288xf32>
    %170 = vector.shape_cast %169 : vector<1x1x4x288xf32> to vector<4x288xf32>
    %171 = arith.addf %168, %170 : vector<4x288xf32>
    %cst_222 = arith.constant 0.000000e+00 : f32
    %172 = vector.broadcast %cst_222 : f32 to vector<4x288xf32>
    %173 = arith.maximumf %171, %172 : vector<4x288xf32>
    %c0_223 = arith.constant 0 : index
    %c0_224 = arith.constant 0 : index
    %c0_225 = arith.constant 0 : index
    %174 = vector.load %arg7[%c0_223, %c0_224, %c0_225] : memref<2x4x288xf32, #tpu.memory_space<vmem>>, vector<1x4x288xf32>
    %175 = vector.shape_cast %174 : vector<1x4x288xf32> to vector<4x288xf32>
    %176 = vector.shape_cast %173 : vector<4x288xf32> to vector<1x4x288xf32>
    tpu.vector_store %arg7[%c0_223, %c0_224, %c0_225], %176 {strides = array<i32>} : memref<2x4x288xf32, #tpu.memory_space<vmem>>, vector<1x4x288xf32>,
    %177 = vector.extract_strided_slice %167 {offsets = [0, 288], sizes = [4, 288], strides = [1, 1]} : vector<4x576xf32> to vector<4x288xf32>
    %c1_226 = arith.constant 1 : index
    %c0_227 = arith.constant 0 : index
    %c0_228 = arith.constant 0 : index
    %c19_229 = arith.constant 19 : index
    %178 = vector.load %arg1[%c1_226, %c0_227, %c0_228, %c19_229] : memref<2x1x4x384xf32, #tpu.memory_space<vmem>>, vector<1x1x4x288xf32>
    %179 = vector.shape_cast %178 : vector<1x1x4x288xf32> to vector<4x288xf32>
    %180 = arith.addf %177, %179 : vector<4x288xf32>
    %cst_230 = arith.constant 0.000000e+00 : f32
    %181 = vector.broadcast %cst_230 : f32 to vector<4x288xf32>
    %182 = arith.maximumf %180, %181 : vector<4x288xf32>
    %c1_231 = arith.constant 1 : index
    %c0_232 = arith.constant 0 : index
    %c0_233 = arith.constant 0 : index
    %183 = vector.load %arg7[%c1_231, %c0_232, %c0_233] : memref<2x4x288xf32, #tpu.memory_space<vmem>>, vector<1x4x288xf32>
    %184 = vector.shape_cast %183 : vector<1x4x288xf32> to vector<4x288xf32>
    %185 = vector.shape_cast %182 : vector<4x288xf32> to vector<1x4x288xf32>
    tpu.vector_store %arg7[%c1_231, %c0_232, %c0_233], %185 {strides = array<i32>} : memref<2x4x288xf32, #tpu.memory_space<vmem>>, vector<1x4x288xf32>,
    return
  }
  func.func @transform_0(%arg0: i32) -> (i32, i32, i32, i32) {
    %c0_i32 = arith.constant 0 : i32
    %c0_i32_0 = arith.constant 0 : i32
    %c0_i32_1 = arith.constant 0 : i32
    %c0_i32_2 = arith.constant 0 : i32
    return %arg0, %c0_i32, %c0_i32_0, %c0_i32_1 : i32, i32, i32, i32
  }
  func.func @transform_1(%arg0: i32) -> (i32, i32) {
    %c0_i32 = arith.constant 0 : i32
    %c0_i32_0 = arith.constant 0 : i32
    %c0_i32_1 = arith.constant 0 : i32
    return %c0_i32, %c0_i32_0 : i32, i32
  }
  func.func @transform_2(%arg0: i32) -> (i32, i32) {
    %c0_i32 = arith.constant 0 : i32
    %c0_i32_0 = arith.constant 0 : i32
    %c0_i32_1 = arith.constant 0 : i32
    return %c0_i32, %c0_i32_0 : i32, i32
  }
  func.func @transform_3(%arg0: i32) -> (i32, i32) {
    %c0_i32 = arith.constant 0 : i32
    %c0_i32_0 = arith.constant 0 : i32
    %c0_i32_1 = arith.constant 0 : i32
    return %c0_i32, %c0_i32_0 : i32, i32
  }
  func.func @transform_4(%arg0: i32) -> (i32, i32) {
    %c0_i32 = arith.constant 0 : i32
    %c0_i32_0 = arith.constant 0 : i32
    %c0_i32_1 = arith.constant 0 : i32
    return %c0_i32, %c0_i32_0 : i32, i32
  }
  func.func @transform_5(%arg0: i32) -> (i32, i32) {
    %c0_i32 = arith.constant 0 : i32
    %c0_i32_0 = arith.constant 0 : i32
    %c0_i32_1 = arith.constant 0 : i32
    return %c0_i32, %c0_i32_0 : i32, i32
  }
  func.func @transform_6(%arg0: i32) -> (i32, i32, i32) {
    %c0_i32 = arith.constant 0 : i32
    %c0_i32_0 = arith.constant 0 : i32
    %c0_i32_1 = arith.constant 0 : i32
    return %arg0, %c0_i32, %c0_i32_0 : i32, i32, i32
  }
}

</mosaic_0001>

<bundles_post_ra>
// kernel: tpu_custom_call.1
= control target key start
LH: loop header
LB: loop body
LE: loop exit
PB: predicated region body
PF: predicated region fallthrough
CT: control target
= control target key end

     0   :  { %11 = vsyncpa [#allocation6], 0  ;;  %s2505_s0 = inlined_call_operand.hbm [shape: f32[2,1,4,384], index: 0, kind: input, shape index: {}]   ;;  %s2506_s1 = inlined_call_operand.vmem [shape: bf16[4,36], index: 1, kind: input, shape index: {}]   ;;  %s2507_s2 = inlined_call_operand.vmem [shape: bf16[4,36], index: 2, kind: input, shape index: {}]   ;;  %s2508_s3 = inlined_call_operand.vmem [shape: f32[4,1], index: 3, kind: input, shape index: {}]   ;;  %s2509_s4 = inlined_call_operand.vmem [shape: f32[4,1], index: 4, kind: input, shape index: {}]   ;;  %s2510_s5 = inlined_call_operand.vmem [shape: f32[1,576], index: 5, kind: input, shape index: {}]   ;;  %s2511_s6 = inlined_call_operand.hbm [shape: f32[2,4,288], index: 6, kind: output, shape index: {}]  }
   0x1   :  { %12 = vsyncpa [#allocation7], 0  ;;  %s2021_s21 = smov [#allocation5]   ;;  %s1973_s25 = scalar_lea.hbm %s2505_s0, 384 }
   0x2   :  { %s18_s22 = sshll.u32 %s2021_s21, 4  ;;  %p1974_p0 = scmp.ne.s32.totalorder %s2505_s0, %s1973_s25  ;;  %s19_s22 = int_to_ptr.vmem [resolvable:$true] %s18_s22 }
   0x3   :  { %p1977_p1 = scmp.lt.u32.totalorder %s1973_s25, %s2505_s0 }
   0x5   :  { %p1979_p2 = pnand %p1977_p1, %p1974_p0 }
   0x7   :  { %1982 = shalt.err (!%p1979_p2)
}
   0x8   :  { %s1983_s30 = scalar_lea.vmem %s19_s22, 384  ;;  %p1988_p4 = scmp.lt.s32.totalorder %s19_s22, %s19_s22 }
   0x9   :  { %p1984_p3 = scmp.ne.s32.totalorder %s19_s22, %s1983_s30  ;;  %p1989_p5 = scmp.lt.s32.totalorder %s1983_s30, %s1983_s30 }
   0xb   :  { %p1990_p6 = por %p1989_p5, %p1988_p4 }
   0xd   :  { %p1991_p7 = pnand %p1990_p6, %p1984_p3 }
   0xf   :  { %1994 = shalt.err (!%p1991_p7)
}
  0x10   :  { %s2022_s7 = smov 192   ;;  %s2023_s8 = smov 12  }
  0x11   :  { %24 = dma.hbm_to_vmem [thread:$0]  %s2505_s0, 384, %s19_s22, [#allocation6], %s2022_s7, %s2022_s7, %s2023_s8  }
  0x12   :  { %2017 = dma.done.wait [#allocation6], 384  }
  0x13   :  { %2018 = vsyncadd [#allocation6], 4294966912  ;;  %v94_v0 = vld [vmem:[#allocation5 + $0x8] sm:$0xf]  ;;  %v93_v2 = vld [vmem:[#allocation5] sm:$0xff]  ;;  %s2024_s11 = smov 126  }
  0x14   :  { %v61_v1 = vld [vmem:[#allocation5 + $0x8] sm:$0xf]  ;;  %v1826_v3 = vpack.c.bf16 %v94_v0, %v94_v0  ;;  %v96_v5 = vcombine.high %v93_v2, %v93_v2  ;;  %v303_v6 = vld [vmem:[#allocation5 + $0xc] sm:$0xff]  ;;  %s2025_s12 = smov 127   ;;  %s2026_s0 = smov 32   ;;  %vm58_vm0 = vcmask 254976  }
  0x15   :  { %v1824_v4 = vpack.c.bf16 %v61_v1, %v61_v1  ;;  %v123_v7 = vld [vmem:[#allocation5 + $0x8] sm:$0xf]  ;;  %v306_v8 = vcombine.high %v303_v6, %v303_v6  ;;  %s2027_s13 = smov 110   ;;  %s2028_s14 = smov 31   ;;  %v486_v28 = vld [vmem:[#allocation5 + $0x14] sm:$0xf] }
  0x16   :  { %111 = vrot.lane.b32.xlu1 %v1826_v3, %s2024_s11  ;;  %v2099_v10 = vpack.c.bf16 %v96_v5, %v93_v2  ;;  %v1828_v11 = vpack.c.bf16 %v123_v7, %v123_v7  ;;  %v40_v14 = vld [vmem:[#allocation5 + $0x8] sm:$0xf]  ;;  %s2029_s15 = smov 14   ;;  %s2030_s16 = smov 30   ;;  %v515_v29 = vld [vmem:[#allocation5 + $0x14] sm:$0xf]  ;;  %v1852_v30 = vpack.c.bf16 %v486_v28, %v486_v28 }
  0x17   :  { %v77_v9 = vrot.slane %v1824_v4, 6  ;;  %v2102_v12 = vpack.c.bf16 %v306_v8, %v303_v6  ;;  %v1822_v16 = vpack.c.bf16 %v40_v14, %v40_v14  ;;  %v154_v18 = vld [vmem:[#allocation5 + $0x8] sm:$0xf]  ;;  %s2031_s17 = smov 109   ;;  %s2032_s18 = smov 108   ;;  %v1854_v31 = vpack.c.bf16 %v515_v29, %v515_v29 }
  0x18   :  { %57 = vst [vmem:[#allocation2] sm:$0x33] %v2099_v10  ;;  %v139_v13 = vrot.slane %v1828_v11, 6  ;;  %v76_v15 = vrot.slane %v2099_v10, 6  ;;  %v183_v19 = vld [vmem:[#allocation5 + $0x8] sm:$0xf]  ;;  %v1830_v20 = vpack.c.bf16 %v154_v18, %v154_v18 }
  0x19   :  { %80 = vrot.lane.b32.xlu0 %v77_v9, %s2025_s12  ;;  %v351_v17 = vrot.slane %v2102_v12, 6  ;;  %59 = vst.msk [vmem:[#allocation2 + $0x8] sm:$0x3] %vm58_vm0, %v1822_v16  ;;  %v1832_v21 = vpack.c.bf16 %v183_v19, %v183_v19  ;;  %v214_v23 = vld [vmem:[#allocation5 + $0x8] sm:$0xf]  ;;  %s2033_s19 = smov 92  }
  0x1a   :  { %109 = vrot.lane.b32.xlu1 %v2099_v10, %s2024_s11  ;;  %v243_v24 = vld [vmem:[#allocation5 + $0x8] sm:$0xf]  ;;  %v1834_v25 = vpack.c.bf16 %v214_v23, %v214_v23  ;;  %s2034_s20 = smov 91   ;;  %s2035_s21 = smov 124   ;;  %v531_v32 = vrot.slane %v1854_v31, 6  ;;  %v2040_v45 = vmov 0  }
  0x1b   :  { %v199_v22 = vrot.slane %v1832_v21, 6  ;;  %v1836_v26 = vpack.c.bf16 %v243_v24, %v243_v24  ;;  %s2036_s22 = smov 123   ;;  %v274_v33 = vld [vmem:[#allocation5 + $0x8] sm:$0xf]  ;;  %v546_v35 = vld [vmem:[#allocation5 + $0x14] sm:$0xf]  ;;  %707 = vmatprep.mubr.bf16.mxu0 %v2040_v45  ;;  %748 = vmatprep.mubr.bf16.mxu1 %v2040_v45 }
  0x1c   :  { %v1838_v34 = vpack.c.bf16 %v274_v33, %v274_v33  ;;  %v336_v36 = vld [vmem:[#allocation5 + $0x14] sm:$0xf]  ;;  %s2037_s23 = smov 13   ;;  %s2038_s24 = smov 90   ;;  %v1856_v37 = vpack.c.bf16 %v546_v35, %v546_v35  ;;  %1912 = vset.pattern.permute.xlu0 %v2040_v45  ;;  %1913 = vset.pattern.permute.xlu1 %v2040_v45  ;;  %v797_v53 = vld [vmem:[%s2508_s3] sm:$0xf] }
  0x1d   :  { %319 = vrot.lane.b32.xlu0 %v2102_v12, %s2026_s0  ;;  %v259_v27 = vrot.slane %v1836_v26, 6  ;;  %v1842_v38 = vpack.c.bf16 %v336_v36, %v336_v36  ;;  %v398_v39 = vld [vmem:[#allocation5 + $0x14] sm:$0xf]  ;;  %s2039_s25 = smov 122   ;;  %v808_v54 = vld [vmem:[%s2509_s4] sm:$0xf] }
  0x1e   :  { %142 = vrot.lane.b32.xlu1 %v139_v13, %s2027_s13  ;;  %v304_v40 = vld [vmem:[#allocation5 + $0x14] sm:$0xf]  ;;  %v1846_v42 = vpack.c.bf16 %v398_v39, %v398_v39  ;;  %vm91_vm1 = vcmask 257026   ;;  %vm84_vm2 = vcmask 1043456   ;;  %vm329_vm3 = vcmask 1041664   ;;  %s2045_s9 = smov 115  }
  0x1f   :  { %v352_v41 = vrot.slane %v1842_v38, 6  ;;  %v456_v43 = vld [vmem:[#allocation5 + $0x14] sm:$0xf]  ;;  %v1840_v44 = vpack.c.bf16 %v304_v40, %v304_v40  ;;  %vm330_vm4 = vcmask 1045508   ;;  %vm2517_vm5 = vcmask 1031168  }
  0x20   :  { %v370_v46 = vld [vmem:[#allocation5 + $0x14] sm:$0xf]  ;;  %v414_v47 = vrot.slane %v1846_v42, 6  ;;  %v1850_v48 = vpack.c.bf16 %v456_v43, %v456_v43  ;;  %vm2530_vm6 = vcmask 261120   ;;  %vm2164_vm7 = vmor %vm330_vm4, %vm329_vm3  ;;  %vm363_vm8 = vcmask 1043714  }
  0x21   :  { %78 = vrot.lane.b32.xlu0 %v76_v15, %s2025_s12  ;;  %v1844_v49 = vpack.c.bf16 %v370_v46, %v370_v46  ;;  %v428_v50 = vld [vmem:[#allocation5 + $0x14] sm:$0xf]  ;;  %vm364_vm9 = vcmask 1047558   ;;  %vm86_vm10 = vcmask 1039360   ;;  %vm2526_vm11 = vcmask 252928  }
  0x22   :  { %353 = vrot.lane.b32.xlu1 %v351_v17, %s2028_s14  ;;  %v472_v51 = vrot.slane %v1850_v48, 6  ;;  %v1848_v52 = vpack.c.bf16 %v428_v50, %v428_v50  ;;  %vm2180_vm12 = vmor %vm364_vm9, %vm363_vm8  ;;  %vm2514_vm13 = vcmask 900096   ;;  %vm2521_vm14 = vcmask 113664  }
  0x23   :  { %vm2529_vm15 = vcmask 244736   ;;  %vm2512_vm3 = vcmask 891904   ;;  %vm2513_vm4 = vcmask 883712   ;;  %vm2515_vm8 = vcmask 752640  }
  0x24   :  { %vm2523_vm9 = vcmask 517120  }
  0x25   :  { %140 = vrot.lane.b32.xlu0 %v76_v15, %s2027_s13 }
  0x26   :  { %415 = vrot.lane.b32.xlu1 %v351_v17, %s2029_s15 }
  0x29   :  { %385 = vrot.lane.b32.xlu0 %v2102_v12, %s2030_s16 }
  0x2a   :  { %171 = vrot.lane.b32.xlu1 %v1830_v20, %s2031_s17 }
  0x2d   :  { %169 = vrot.lane.b32.xlu0 %v2099_v10, %s2031_s17 }
  0x2e   :  { %202 = vrot.lane.b32.xlu1 %v199_v22, %s2032_s18 }
  0x31   :  { %200 = vrot.lane.b32.xlu0 %v76_v15, %s2032_s18 }
  0x32   :  { %231 = vrot.lane.b32.xlu1 %v1834_v25, %s2033_s19 }
  0x35   :  { %229 = vrot.lane.b32.xlu0 %v2099_v10, %s2033_s19 }
  0x36   :  { %262 = vrot.lane.b32.xlu1 %v259_v27, %s2034_s20 }
  0x39   :  { %260 = vrot.lane.b32.xlu0 %v76_v15, %s2034_s20 }
  0x3a   :  { %503 = vrot.lane.b32.xlu1 %v1852_v30, %s2035_s21 }
  0x3d   :  { %501 = vrot.lane.b32.xlu0 %v2102_v12, %s2035_s21 }
  0x3e   :  { %534 = vrot.lane.b32.xlu1 %v531_v32, %s2036_s22 }
  0x41   :  { %532 = vrot.lane.b32.xlu0 %v351_v17, %s2036_s22 }
  0x42   :  { %473 = vrot.lane.b32.xlu1 %v351_v17, %s2023_s8 }
  0x45   :  { %443 = vrot.lane.b32.xlu0 %v2102_v12, %s2037_s23 }
  0x46   :  { %291 = vrot.lane.b32.xlu1 %v1838_v34, %s2038_s24 }
  0x49   :  { %289 = vrot.lane.b32.xlu0 %v2099_v10, %s2038_s24 }
  0x4a   :  { %563 = vrot.lane.b32.xlu1 %v1856_v37, %s2039_s25 }
  0x4d   :  { %561 = vrot.lane.b32.xlu0 %v2102_v12, %s2039_s25 }
  0x4e   :  { %355 = vrot.lane.b32.xlu1 %v352_v41, %s2028_s14 }
  0x51   :  { %321 = vrot.lane.b32.xlu0 %v1840_v44, %s2026_s0 }
  0x52   :  { %417 = vrot.lane.b32.xlu1 %v414_v47, %s2029_s15 }
  0x55   :  { %387 = vrot.lane.b32.xlu0 %v1844_v49, %s2030_s16 }
  0x56   :  { %475 = vrot.lane.b32.xlu1 %v472_v51, %s2023_s8 }
  0x59   :  { %445 = vrot.lane.b32.xlu0 %v1848_v52, %s2037_s23 }
  0x5a   :  { %811 = vperm.xlu1 %1913, %v808_v54  }
  0x5d   :  { %800 = vperm.xlu0 %1912, %v797_v53  }
  0x88   :  { %v112_v55 = vpop.permute.xlu1 %111 }
  0x89   :  { %121 = vst.msk [vmem:[#allocation2 + $0x1c] sm:$0x3] %vm58_vm0, %v112_v55  ;;  %v114_v58 = vrot.slane %v112_v55, 4 }
  0x8b   :  { %v81_v56 = vpop.permute.xlu0 %80 }
  0x8c   :  { %92 = vst.msk [vmem:[#allocation2 + $0x8] sm:$0xc] %vm91_vm1, %v81_v56  ;;  %v110_v57 = vpop.permute.xlu1 %109  ;;  %v83_v4 = vrot.slane %v81_v56, 4 }
  0x8d   :  { %v113_v59 = vrot.slane %v110_v57, 4 }
  0x8f   :  { %v2161_v60 = vpop.permute.xlu0 %319  ;;  %v115_v61 = vsel %vm84_vm2, %v113_v59, %v114_v58 }
  0x90   :  { %v323_v63 = vrot.slane %v2161_v60, 4  ;;  %v117_v0 = vsel %vm2517_vm5, %v110_v57, %v115_v61  ;;  %v143_v1 = vpop.permute.xlu1 %142  ;;  %vm2527_vm5 = vcmask 105472  }
  0x91   :  { %120 = vst [vmem:[#allocation2 + $0x14] sm:$0x33] %v117_v0  ;;  %152 = vst.msk [vmem:[#allocation2 + $0x1c] sm:$0xc] %vm91_vm1, %v143_v1  ;;  %v145_v12 = vrot.slane %v143_v1, 4 }
  0x92   :  { %v325_v2 = vsel %vm2530_vm6, %v323_v63, %v2161_v60 }
  0x93   :  { %332 = vst.msk [vmem:[#allocation2 + $0x8] sm:$0x33] %vm2164_vm7, %v325_v2  ;;  %v79_v3 = vpop.permute.xlu0 %78 }
  0x94   :  { %v82_v5 = vrot.slane %v79_v3, 4  ;;  %v2177_v6 = vpop.permute.xlu1 %353 }
  0x95   :  { %v357_v9 = vrot.slane %v2177_v6, 4 }
  0x96   :  { %v85_v7 = vsel %vm84_vm2, %v82_v5, %v83_v4 }
  0x97   :  { %v87_v10 = vsel %vm86_vm10, %v79_v3, %v85_v7  ;;  %v141_v11 = vpop.permute.xlu0 %140  ;;  %v359_v13 = vsel %vm2526_vm11, %v357_v9, %v2177_v6 }
  0x98   :  { %90 = vst [vmem:[#allocation2] sm:$0xcc] %v87_v10  ;;  %v144_v14 = vrot.slane %v141_v11, 4  ;;  %366 = vst.msk [vmem:[#allocation2 + $0x8] sm:$0xcc] %vm2180_vm12, %v359_v13  ;;  %v2192_v15 = vpop.permute.xlu1 %415 }
  0x99   :  { %v419_v17 = vrot.slane %v2192_v15, 4 }
  0x9a   :  { %v146_v16 = vsel %vm84_vm2, %v144_v14, %v145_v12 }
  0x9b   :  { %v148_v18 = vsel %vm2514_vm13, %v141_v11, %v146_v16  ;;  %v2197_v19 = vpop.permute.xlu0 %385  ;;  %v421_v20 = vsel %vm2521_vm14, %v419_v17, %v2192_v15  ;;  %vm2518_vm13 = vcmask 1014784  }
  0x9c   :  { %151 = vst [vmem:[#allocation2 + $0x14] sm:$0xcc] %v148_v18  ;;  %v389_v21 = vrot.slane %v2197_v19, 4  ;;  %425 = vst.msk [vmem:[#allocation2 + $0x1c] sm:$0xcc] %vm2180_vm12, %v421_v20  ;;  %v172_v22 = vpop.permute.xlu1 %171 }
  0x9d   :  { %v174_v24 = vrot.slane %v172_v22, 4  ;;  %181 = vst.msk [vmem:[#allocation2 + $0x30] sm:$0x3] %vm58_vm0, %v172_v22 }
  0x9e   :  { %v391_v23 = vsel %vm2529_vm15, %v389_v21, %v2197_v19  ;;  %v574_v19 = vld [vmem:[%s2506_s1] sm:$0x3] }
  0x9f   :  { %395 = vst.msk [vmem:[#allocation2 + $0x1c] sm:$0x33] %vm2164_vm7, %v391_v23  ;;  %v170_v25 = vpop.permute.xlu0 %169 }
  0xa0   :  { %v173_v26 = vrot.slane %v170_v25, 4  ;;  %v203_v27 = vpop.permute.xlu1 %202 }
  0xa1   :  { %v205_v29 = vrot.slane %v203_v27, 4  ;;  %212 = vst.msk [vmem:[#allocation2 + $0x30] sm:$0xc] %vm91_vm1, %v203_v27 }
  0xa2   :  { %v175_v28 = vsel %vm84_vm2, %v173_v26, %v174_v24 }
  0xa3   :  { %v177_v30 = vsel %vm2512_vm3, %v170_v25, %v175_v28  ;;  %v201_v31 = vpop.permute.xlu0 %200  ;;  %v1916_v32 = vld [vmem:[#allocation2 + $0x4] ss:$20 sps:$4 sm:$0xff]   ;;  %v1918_v33 = vld [vmem:[#allocation2] ss:$20 sps:$4 sm:$0xff]   ;;  %vm2516_vm3 = vcmask 744448  }
  0xa4   :  { %180 = vst [vmem:[#allocation2 + $0x28] sm:$0x33] %v177_v30  ;;  %v204_v34 = vrot.slane %v201_v31, 4  ;;  %v232_v35 = vpop.permute.xlu1 %231  ;;  %675 = vmatprep.subr.bf16.mxu0 %v1916_v32 }
  0xa5   :  { %v234_v37 = vrot.slane %v232_v35, 4  ;;  %241 = vst.msk [vmem:[#allocation2 + $0x44] sm:$0x3] %vm58_vm0, %v232_v35  ;;  %676 = vmatpush1.bf16.msra.mxu0 %v1918_v33 }
  0xa6   :  { %v206_v36 = vsel %vm84_vm2, %v204_v34, %v205_v29  ;;  %v1919_v38 = vld [vmem:[#allocation2 + $0xc] ss:$20 sps:$4 sm:$0xff]   ;;  %v1921_v39 = vld [vmem:[#allocation2 + $0x8] ss:$20 sps:$4 sm:$0xff]  }
  0xa7   :  { %v208_v40 = vsel %vm2513_vm4, %v201_v31, %v206_v36  ;;  %v230_v41 = vpop.permute.xlu0 %229  ;;  %716 = vmatprep.subr.bf16.mxu1 %v1919_v38  ;;  %vm367_vm4 = vcmask 519170  }
  0xa8   :  { %211 = vst [vmem:[#allocation2 + $0x28] sm:$0xcc] %v208_v40  ;;  %v233_v42 = vrot.slane %v230_v41, 4  ;;  %v263_v43 = vpop.permute.xlu1 %262  ;;  %717 = vmatpush1.bf16.msra.mxu1 %v1921_v39 }
  0xa9   :  { %v265_v46 = vrot.slane %v263_v43, 4  ;;  %272 = vst.msk [vmem:[#allocation2 + $0x44] sm:$0xc] %vm91_vm1, %v263_v43 }
  0xaa   :  { %v235_v44 = vsel %vm84_vm2, %v233_v42, %v234_v37 }
  0xab   :  { %v237_v47 = vsel %vm2515_vm8, %v230_v41, %v235_v44  ;;  %v261_v48 = vpop.permute.xlu0 %260  ;;  %vm2519_vm8 = vcmask 1006592   ;;  %v2041_v44 = vmov 0.0  }
  0xac   :  { %240 = vst [vmem:[#allocation2 + $0x3c] sm:$0x33] %v237_v47  ;;  %v264_v49 = vrot.slane %v261_v48, 4  ;;  %v504_v50 = vpop.permute.xlu1 %503 }
  0xad   :  { %v506_v52 = vrot.slane %v504_v50, 4  ;;  %513 = vst.msk [vmem:[#allocation2 + $0x4c] sm:$0x3] %vm2523_vm9, %v504_v50 }
  0xae   :  { %v266_v51 = vsel %vm84_vm2, %v264_v49, %v265_v46 }
  0xaf   :  { %v268_v53 = vsel %vm2516_vm3, %v261_v48, %v266_v51  ;;  %v502_v54 = vpop.permute.xlu0 %501  ;;  %vm2522_vm3 = vcmask 97280   ;;  %v826_v51 = vlaneseq }
  0xb0   :  { %271 = vst [vmem:[#allocation2 + $0x3c] sm:$0xcc] %v268_v53  ;;  %v505_v55 = vrot.slane %v502_v54, 4  ;;  %v535_v56 = vpop.permute.xlu1 %534 }
  0xb1   :  { %v537_v58 = vrot.slane %v535_v56, 4  ;;  %544 = vst.msk [vmem:[#allocation2 + $0x4c] sm:$0xc] %vm367_vm4, %v535_v56 }
  0xb2   :  { %v507_v57 = vsel %vm84_vm2, %v505_v55, %v506_v52  ;;  %v827_v52 = vshrl.u32 %v826_v51, 7 }
  0xb3   :  { %v509_v59 = vsel %vm2518_vm13, %v502_v54, %v507_v57  ;;  %v533_v61 = vpop.permute.xlu0 %532  ;;  %vm296_vm13 = vcmask 736256   ;;  %v824_v57 = vld [vmem:[%s2510_s5] sm:$0x1f]  ;;  %s2044_s5 = smov 19  }
  0xb4   :  { %512 = vst.msk [vmem:[#allocation2 + $0x44] sm:$0x33] %vm2164_vm7, %v509_v59  ;;  %v536_v0 = vrot.slane %v533_v61, 4  ;;  %v474_v1 = vpop.permute.xlu1 %473  ;;  %v828_v54 = vsub.s32 0, %v827_v52 }
  0xb5   :  { %v477_v3 = vrot.slane %v474_v1, 4 }
  0xb6   :  { %v538_v2 = vsel %vm84_vm2, %v536_v0, %v537_v58  ;;  %v832_v58 = vsub.s32 1, %v827_v52  ;;  %v2043_v0 = vmov 1983009808  }
  0xb7   :  { %v540_v4 = vsel %vm2519_vm8, %v533_v61, %v538_v2  ;;  %v444_v5 = vpop.permute.xlu0 %443  ;;  %v1922_v7 = vld [vmem:[#allocation2 + $0x2c] ss:$20 sps:$4 sm:$0xff]   ;;  %v1924_v10 = vld [vmem:[#allocation2 + $0x28] ss:$20 sps:$4 sm:$0xff]   ;;  %v479_v11 = vsel %vm2522_vm3, %v477_v3, %v474_v1  ;;  %vm2520_vm8 = vcmask 998400   ;;  %v868_v1 = vunpack.c.l.s4 %v2043_v0 }
  0xb8   :  { %543 = vst.msk [vmem:[#allocation2 + $0x44] sm:$0xcc] %vm2180_vm12, %v540_v4  ;;  %v447_v12 = vrot.slane %v444_v5, 4  ;;  %483 = vst.msk [vmem:[#allocation2 + $0x30] sm:$0xcc] %vm2180_vm12, %v479_v11  ;;  %v292_v13 = vpop.permute.xlu1 %291  ;;  %677 = vmatprep.subr.bf16.mxu0 %v1922_v7  ;;  %v836_v7 = vsub.s32 2, %v827_v52 }
  0xb9   :  { %v294_v16 = vrot.slane %v292_v13, 4  ;;  %301 = vst.msk [vmem:[#allocation2 + $0x58] sm:$0x3] %vm58_vm0, %v292_v13  ;;  %678 = vmatpush1.bf16.msra.mxu0 %v1924_v10  ;;  %v829_v10 = vrot.slane %v824_v57, %v828_v54  ;;  %v840_v13 = vsub.s32 3, %v827_v52 }
  0xba   :  { %v449_v14 = vsel %vm2527_vm5, %v447_v12, %v444_v5 }
  0xbb   :  { %453 = vst.msk [vmem:[#allocation2 + $0x30] sm:$0x33] %vm2164_vm7, %v449_v14  ;;  %v290_v18 = vpop.permute.xlu0 %289  ;;  %v833_v14 = vrot.slane %v824_v57, %v832_v58 }
  0xbc   :  { %v293_v20 = vrot.slane %v290_v18, 4  ;;  %v564_v22 = vpop.permute.xlu1 %563 }
  0xbd   :  { %v566_v24 = vrot.slane %v564_v22, 4  ;;  %573 = vst.msk [vmem:[#allocation2 + $0x60] sm:$0x3] %vm2523_vm9, %v564_v22  ;;  %v869_v22 = vunpack.c.0.s8 %v868_v1 }
  0xbe   :  { %v295_v23 = vsel %vm84_vm2, %v293_v20, %v294_v16 }
  0xbf   :  { %v297_v25 = vsel %vm296_vm13, %v290_v18, %v295_v23  ;;  %v562_v26 = vpop.permute.xlu0 %561 }
  0xc0   :  { %300 = vst [vmem:[#allocation2 + $0x50] sm:$0x33] %v297_v25  ;;  %v565_v27 = vrot.slane %v562_v26, 4  ;;  %v356_v28 = vpop.permute.xlu1 %355 }
  0xc1   :  { %v360_v30 = vsel %vm2526_vm11, %v357_v9, %v356_v28  ;;  %vm891_vm11 = vcmask 414724  }
  0xc2   :  { %v567_v29 = vsel %vm84_vm2, %v565_v27, %v566_v24  ;;  %v1925_v31 = vld [vmem:[#allocation2 + $0x34] ss:$20 sps:$4 sm:$0xff]   ;;  %v1927_v32 = vld [vmem:[#allocation2 + $0x30] ss:$20 sps:$4 sm:$0xff]   ;;  %368 = vst.msk [vmem:[#allocation2 + $0x10] sm:$0xc] %vm367_vm4, %v360_v30  ;;  %v837_v27 = vrot.slane %v824_v57, %v836_v7 }
  0xc3   :  { %v569_v33 = vsel %vm2520_vm8, %v562_v26, %v567_v29  ;;  %v322_v34 = vpop.permute.xlu0 %321  ;;  %718 = vmatprep.subr.bf16.mxu1 %v1925_v31  ;;  %vm2528_vm8 = vcmask 1041408   ;;  %v841_v31 = vrot.slane %v824_v57, %v840_v13 }
  0xc4   :  { %572 = vst.msk [vmem:[#allocation2 + $0x58] sm:$0x33] %vm2164_vm7, %v569_v33  ;;  %v326_v35 = vsel %vm2530_vm6, %v323_v63, %v322_v34  ;;  %v418_v6 = vpop.permute.xlu1 %417  ;;  %719 = vmatpush1.bf16.msra.mxu1 %v1927_v32  ;;  %v1933_v49 = vld [vmem:[#allocation2 + $0x60] ss:$0 sps:$4 sm:$0x33]   ;;  %v2291_v34 = vsub.s32 %v869_v22, %v827_v52  ;;  %vm919_vm6 = vcmask 941056  }
  0xc5   :  { %334 = vst.msk [vmem:[#allocation2 + $0x10] sm:$0x3] %vm2523_vm9, %v326_v35  ;;  %v422_v9 = vsel %vm2521_vm14, %v419_v17, %v418_v6  ;;  %vm2525_vm14 = vcmask 293888   ;;  %v673_v50 = vsel %vm2528_vm8, %v1933_v49, 0 }
  0xc6   :  { %426 = vst.msk [vmem:[#allocation2 + $0x24] sm:$0xc] %vm367_vm4, %v422_v9 }
  0xc7   :  { %v388_v36 = vpop.permute.xlu0 %387  ;;  %v587_v37 = vld [vmem:[#allocation2 + $0x50] sm:$0x33] }
  0xc8   :  { %v392_v60 = vsel %vm2529_vm15, %v389_v21, %v388_v36  ;;  %v1789_v38 = vcombine.high %v587_v37, %v587_v37  ;;  %v1788_v63 = vcombine.low %v587_v37, %v587_v37  ;;  %v476_v39 = vpop.permute.xlu1 %475  ;;  %vm894_vm15 = vcmask 566680  }
  0xc9   :  { %396 = vst.msk [vmem:[#allocation2 + $0x24] sm:$0x3] %vm2523_vm9, %v392_v60  ;;  %v480_v40 = vsel %vm2522_vm3, %v477_v3, %v476_v39  ;;  %vm2524_vm3 = vmmov 0  }
  0xca   :  { %1793 = vmatprep.subr.msk.bf16.mxu0 %vm2528_vm8, %v1789_v38  ;;  %v661_v15 = vsel %vm2528_vm8, %v1788_v63, 0  ;;  %484 = vst.msk [vmem:[#allocation2 + $0x38] sm:$0xc] %vm367_vm4, %v480_v40  ;;  %v844_v63 = vsub.s32 4, %v827_v52 }
  0xcb   :  { %v446_v17 = vpop.permute.xlu0 %445  ;;  %680 = vmatpush1.bf16.msra.mxu0 %v661_v15  ;;  %v588_v21 = vld [vmem:[#allocation2 + $0x58] sm:$0x33] }
  0xcc   :  { %v450_v41 = vsel %vm2527_vm5, %v447_v12, %v446_v17  ;;  %v1791_v42 = vcombine.high %v588_v21, %v588_v21  ;;  %v1790_v43 = vcombine.low %v588_v21, %v588_v21  ;;  %1865 = vmatprep.subr.bf16.mxu0 %v2041_v44  ;;  %vm885_vm5 = vcmask 154624  }
  0xcd   :  { %454 = vst.msk [vmem:[#allocation2 + $0x38] sm:$0x3] %vm2523_vm9, %v450_v41  ;;  %vm861_vm9 = vcmask 148480  }
  0xce   :  { %1794 = vmatmul.mubr.msk.bf16.vlgmr.msra.gmra.mrb[0].mxu0 %vm2525_vm14, %v574_v19  ;;  %1795 = vmatprep.subr.msk.bf16.mxu1 %vm2528_vm8, %v1791_v42  ;;  %v667_v46 = vsel %vm2528_vm8, %v1790_v43, 0  ;;  %862 = vst.msk [vmem:[#allocation3] sm:$0x3] %vm861_vm9, %v2040_v45  ;;  %897 = vst.msk [vmem:[#allocation3 + $0x6] sm:$0x3] %vm861_vm9, %v2040_v45  ;;  %v845_v42 = vrot.slane %v824_v57, %v844_v63  ;;  %vm888_vm9 = vcmask 1041560  }
  0xcf   :  { %721 = vmatpush1.bf16.msra.mxu1 %v667_v46  ;;  %1871 = vmatprep.mubr.msk.bf16.mxu0 %vm2524_vm3, %v2041_v44  ;;  %vm889_vm3 = vcmask 1043458  }
  0xd0   :  { %v1931_v47 = vld [vmem:[#allocation2 + $0x10] ss:$20 sps:$4 sm:$0xff]  }
  0xd1   :  { %1866 = vmatpush3.bf16.msra.mxu0 %v1931_v47 }
  0xd2   :  { %1796 = vmatmul.mubr.msk.bf16.vlgmr.msra.gmra.mrb[0].mxu1 %vm2525_vm14, %v574_v19  ;;  %1867 = vmatprep.subr.bf16.mxu0 %v2041_v44 }
  0xd3   :  { %1563 = vmatprep.mubr.bf16.mxu1 %v2040_v45 }
  0xd4   :  { %v1932_v48 = vld [vmem:[#allocation2 + $0x38] ss:$20 sps:$4 sm:$0xff]  }
  0xd5   :  { %1868 = vmatpush3.bf16.msra.mxu0 %v1932_v48 }
  0xd6   :  { %1869 = vmatprep.subr.bf16.mxu0 %v2041_v44 }
  0xd9   :  { %1870 = vmatpush3.bf16.msra.mxu0 %v673_v50  ;;  %v812_v56 = vpop.permute.xlu1 %811 }
  0xdc   :  { %1872 = vmatmul.mubr.msk.bf16.vlgmr.msra.gmra.mrb[4].mxu0 %vm2525_vm14, %v574_v19  ;;  %v801_v53 = vpop.permute.xlu0 %800  ;;  %vm890_vm14 = vmor %vm889_vm3, %vm888_vm9  ;;  %vm2548_vm9 = vcmask 252928  }
  0xdd   :  { %1604 = vmatprep.mubr.bf16.mxu0 %v2040_v45  ;;  %vm2297_vm8 = vmor %vm891_vm11, %vm890_vm14  ;;  %vm2541_vm11 = vcmask 752640   ;;  %vm2542_vm14 = vcmask 744448  }
 0x1a1   :  { %v709_v55 = vpop.f32.mrb[0].mxu0 }
 0x1a2   :  { %v711_v59 = vpop.f32.mrb[1].mxu0  ;;  %v803_v61 = vmul.f32 %v801_v53, %v709_v55 }
 0x1a3   :  { %v713_v2 = vpop.f32.mrb[2].mxu0  ;;  %v804_v3 = vmul.f32 %v801_v53, %v711_v59 }
 0x1a4   :  { %v714_v4 = vpop.f32.mrb[3].mxu0  ;;  %v814_v5 = vadd.f32 %v812_v56, %v803_v61 }
 0x1a5   :  { %v750_v11 = vpop.f32.mrb[0].mxu1  ;;  %v815_v12 = vadd.f32 %v812_v56, %v804_v3 }
 0x1a6   :  { %v805_v16 = vmul.f32 %v801_v53, %v750_v11  ;;  %v819_v18 = vmax.f32 %v814_v5, 0.0  ;;  %v752_v20 = vpop.f32.mrb[1].mxu1 }
 0x1a7   :  { %v820_v23 = vmax.f32 %v815_v12, 0.0  ;;  %v806_v24 = vmul.f32 %v801_v53, %v752_v20  ;;  %v754_v25 = vpop.f32.mrb[2].mxu1 }
 0x1a8   :  { %v816_v26 = vadd.f32 %v812_v56, %v805_v16  ;;  %v755_v28 = vpop.f32.mrb[3].mxu1  ;;  %v851_v29 = vmul.f32 %v829_v10, %v819_v18 }
 0x1a9   :  { %v817_v30 = vadd.f32 %v812_v56, %v806_v24  ;;  %v852_v32 = vmul.f32 %v833_v14, %v820_v23 }
 0x1aa   :  { %v821_v33 = vmax.f32 %v816_v26, 0.0 }
 0x1ab   :  { %v822_v35 = vmax.f32 %v817_v30, 0.0  ;;  %v1798_v6 = vpack.c.bf16 %v852_v32, %v851_v29 }
 0x1ac   :  { %v853_v9 = vmul.f32 %v837_v27, %v821_v33 }
 0x1ad   :  { %v854_v36 = vmul.f32 %v841_v31, %v822_v35  ;;  %v873_v60 = vrot.slane %v1798_v6, %v2291_v34 }
 0x1ae   :  { %v858_v37 = vpack.c.bf16 %v853_v9, %v853_v9 }
 0x1af   :  { %v1799_v38 = vpack.c.bf16 %v854_v36, %v853_v9  ;;  %v791_v39 = vpop.f32.mrb[4].mxu0 }
 0x1b0   :  { %v880_v40 = vrot.slane %v858_v37, %v2291_v34  ;;  %v807_v15 = vmul.f32 %v801_v53, %v791_v39  ;;  %v1873_v17 = vpop.f32.mrb[5].mxu0 }
 0x1b1   :  { %v794_v21 = vpop.f32.mrb[6].mxu0  ;;  %v907_v49 = vrot.slane %v1799_v38, %v2291_v34 }
 0x1b2   :  { %v881_v19 = vcombine.low %v873_v60, %v880_v40  ;;  %v818_v41 = vadd.f32 %v812_v56, %v807_v15  ;;  %v1874_v43 = vpop.f32.mrb[7].mxu0 }
 0x1b4   :  { %882 = vrot.lane.b32.xlu1 %v881_v19, %s2044_s5  ;;  %v823_v46 = vmax.f32 %v818_v41, 0.0 }
 0x1b6   :  { %v855_v47 = vmul.f32 %v845_v42, %v823_v46 }
 0x1b8   :  { %v860_v48 = vpack.c.bf16 %v855_v47, %v855_v47 }
 0x1ba   :  { %v914_v50 = vrot.slane %v860_v48, %v2291_v34 }
 0x1bc   :  { %v915_v51 = vcombine.low %v907_v49, %v914_v50 }
 0x1be   :  { %916 = vrot.lane.b32.xlu0 %v915_v51, %s2045_s9 }
 0x226   :  { %v883_v52 = vpop.permute.xlu1 %882 }
 0x227   :  { %v884_v54 = vrot.slane %v883_v52, 6 }
 0x229   :  { %v886_v55 = vsel %vm885_vm5, %v884_v54, %v883_v52  ;;  %vm2537_vm5 = vcmask 1031168  }
 0x22a   :  { %893 = vst.msk [vmem:[#allocation3] sm:$0x3f] %vm2297_vm8, %v886_v55 }
 0x22b   :  { %895 = vst.msk [vmem:[#allocation3 + $0x4] sm:$0x3] %vm894_vm15, %v2040_v45 }
 0x230   :  { %v917_v56 = vpop.permute.xlu0 %916 }
 0x231   :  { %v918_v57 = vrot.slane %v917_v56, 2 }
 0x232   :  { %v974_v58 = vld [vmem:[#allocation3] sm:$0x3f] }
 0x233   :  { %v945_v59 = vld [vmem:[#allocation3] sm:$0x3f]  ;;  %v983_v61 = vrot.slane %v974_v58, %v2291_v34  ;;  %v920_v1 = vsel %vm919_vm6, %v917_v56, %v918_v57  ;;  %v976_v24 = vcombine.high %v974_v58, %v974_v58  ;;  %vm2539_vm6 = vcmask 891904  }
 0x234   :  { %v961_v0 = vrot.slane %v945_v59, %v2291_v34  ;;  %v1032_v2 = vld [vmem:[#allocation3] sm:$0x3f]  ;;  %922 = vst.msk [vmem:[#allocation3 + $0x6] sm:$0x3f] %vm2297_vm8, %v920_v1  ;;  %v947_v23 = vcombine.low %v945_v59, %v945_v59  ;;  %vm2547_vm8 = vcmask 105472  }
 0x235   :  { %v1003_v3 = vld [vmem:[#allocation3] sm:$0x3f]  ;;  %991 = vrot.lane.b32.xlu1 %v983_v61, %s2024_s11  ;;  %923 = vst.msk [vmem:[#allocation3 + $0xa] sm:$0x3] %vm894_vm15, %v2040_v45  ;;  %v1041_v5 = vrot.slane %v1032_v2, %v2291_v34  ;;  %v990_v26 = vrot.slane %v976_v24, %v2291_v34  ;;  %v1034_v28 = vcombine.high %v1032_v2, %v1032_v2  ;;  %vm2545_vm15 = vcmask 1041408  }
 0x236   :  { %964 = vrot.lane.b32.xlu0 %v961_v0, %s2025_s12  ;;  %v924_v4 = vld [vmem:[#allocation3] sm:$0x3f]  ;;  %v1019_v7 = vrot.slane %v1003_v3, %v2291_v34  ;;  %v954_v25 = vrot.slane %v947_v23, %v2291_v34  ;;  %v1005_v27 = vcombine.low %v1003_v3, %v1003_v3  ;;  %vm2546_vm3 = vmmov %vm2545_vm15 }
 0x237   :  { %1800 = vst.sshfl [vmem:[#allocation4] sm:$0xf pattern:$0x76325410] %v924_v4  ;;  %v1090_v10 = vld [vmem:[#allocation3] sm:$0x3f]  ;;  %v926_v12 = vcombine.high %v924_v4, %v924_v4  ;;  %v1048_v30 = vrot.slane %v1034_v28, %v2291_v34 }
 0x238   :  { %v1061_v11 = vld [vmem:[#allocation3] sm:$0x3f]  ;;  %v1099_v14 = vrot.slane %v1090_v10, %v2291_v34  ;;  %v1012_v29 = vrot.slane %v1005_v27, %v2291_v34  ;;  %v1092_v32 = vcombine.high %v1090_v10, %v1090_v10 }
 0x239   :  { %1049 = vrot.lane.b32.xlu1 %v1041_v5, %s2031_s17  ;;  %v940_v13 = vrot.slane %v926_v12, %v2291_v34  ;;  %v1077_v16 = vrot.slane %v1061_v11, %v2291_v34  ;;  %v1148_v18 = vld [vmem:[#allocation3] sm:$0x3f]  ;;  %v1063_v31 = vcombine.low %v1061_v11, %v1061_v11 }
 0x23a   :  { %1022 = vrot.lane.b32.xlu0 %v1019_v7, %s2027_s13  ;;  %v1119_v45 = vld [vmem:[#allocation3] sm:$0x3f]  ;;  %v1157_v20 = vrot.slane %v1148_v18, %v2291_v34  ;;  %v1106_v35 = vrot.slane %v1092_v32, %v2291_v34  ;;  %v1150_v9 = vcombine.high %v1148_v18, %v1148_v18 }
 0x23b   :  { %944 = vst.msk [vmem:[#allocation4 + $0x8] sm:$0x3] %vm58_vm0, %v940_v13  ;;  %v1135_v22 = vrot.slane %v1119_v45, %v2291_v34  ;;  %v1070_v33 = vrot.slane %v1063_v31, %v2291_v34  ;;  %v1121_v6 = vcombine.low %v1119_v45, %v1119_v45  ;;  %v1683_v12 = vld [vmem:[#allocation5 + $0xc] sm:$0xff]  ;;  %v1654_v45 = vld [vmem:[#allocation5 + $0x8] sm:$0xf] }
 0x23c   :  { %v1164_v37 = vrot.slane %v1150_v9, %v2291_v34  ;;  %v1374_v60 = vld [vmem:[#allocation3 + $0x6] sm:$0x3f]  ;;  %v1687_v13 = vcombine.high %v1683_v12, %v1683_v12 }
 0x23d   :  { %1107 = vrot.lane.b32.xlu1 %v1099_v14, %s2033_s19  ;;  %v1128_v36 = vrot.slane %v1121_v6, %v2291_v34  ;;  %v1177_v38 = vld [vmem:[#allocation3 + $0x6] sm:$0x3f]  ;;  %v1390_v63 = vrot.slane %v1374_v60, %v2291_v34  ;;  %v1376_v55 = vcombine.low %v1374_v60, %v1374_v60 }
 0x23e   :  { %1080 = vrot.lane.b32.xlu0 %v1077_v16, %s2032_s18  ;;  %v1186_v39 = vrot.slane %v1177_v38, %v2291_v34  ;;  %v1205_v40 = vld [vmem:[#allocation3 + $0x6] sm:$0x3f]  ;;  %v1179_v61 = vcombine.high %v1177_v38, %v1177_v38  ;;  %v1653_v16 = vld [vmem:[#allocation5] sm:$0xff] }
 0x23f   :  { %v1233_v15 = vld [vmem:[#allocation3 + $0x6] sm:$0x3f]  ;;  %v1221_v17 = vrot.slane %v1205_v40, %v2291_v34  ;;  %v1207_v46 = vcombine.low %v1205_v40, %v1205_v40  ;;  %v1383_v58 = vrot.slane %v1376_v55, %v2291_v34  ;;  %v1657_v18 = vcombine.high %v1653_v16, %v1653_v16 }
 0x240   :  { %v1242_v19 = vrot.slane %v1233_v15, %v2291_v34  ;;  %v1261_v21 = vld [vmem:[#allocation3 + $0x6] sm:$0x3f]  ;;  %v1193_v1 = vrot.slane %v1179_v61, %v2291_v34  ;;  %v1235_v3 = vcombine.high %v1233_v15, %v1233_v15 }
 0x241   :  { %1165 = vrot.lane.b32.xlu1 %v1157_v20, %s2038_s24  ;;  %v1345_v41 = vld [vmem:[#allocation3 + $0x6] sm:$0x3f]  ;;  %v1277_v42 = vrot.slane %v1261_v21, %v2291_v34  ;;  %v1214_v48 = vrot.slane %v1207_v46, %v2291_v34  ;;  %v1263_v50 = vcombine.low %v1261_v21, %v1261_v21 }
 0x242   :  { %1138 = vrot.lane.b32.xlu0 %v1135_v22, %s2034_s20  ;;  %v1354_v43 = vrot.slane %v1345_v41, %v2291_v34  ;;  %v1289_v47 = vld [vmem:[#allocation3 + $0x6] sm:$0x3f]  ;;  %v1347_v54 = vcombine.high %v1345_v41, %v1345_v41  ;;  %v1249_v5 = vrot.slane %v1235_v3, %v2291_v34 }
 0x243   :  { %v1298_v49 = vrot.slane %v1289_v47, %v2291_v34  ;;  %v1403_v51 = vld [vmem:[#allocation3 + $0x6] sm:$0x3f]  ;;  %v1270_v52 = vrot.slane %v1263_v50, %v2291_v34  ;;  %v1291_v7 = vcombine.high %v1289_v47, %v1289_v47 }
 0x244   :  { %v1412_v53 = vrot.slane %v1403_v51, %v2291_v34  ;;  %v1317_v56 = vld [vmem:[#allocation3 + $0x6] sm:$0x3f]  ;;  %v1361_v57 = vrot.slane %v1347_v54, %v2291_v34  ;;  %v1405_v2 = vcombine.high %v1403_v51, %v1403_v51 }
 0x245   :  { %962 = vrot.lane.b32.xlu1 %v954_v25, %s2025_s12  ;;  %v1319_v59 = vcombine.low %v1317_v56, %v1317_v56  ;;  %v1333_v10 = vrot.slane %v1317_v56, %v2291_v34  ;;  %v1305_v11 = vrot.slane %v1291_v7, %v2291_v34  ;;  %v1684_v14 = vld [vmem:[#allocation5 + $0x14] sm:$0xf]  ;;  %s2047_s12 = smov [#allocation8]  }
 0x246   :  { %993 = vrot.lane.b32.xlu0 %v990_v26, %s2024_s11  ;;  %v1419_v4 = vrot.slane %v1405_v2, %v2291_v34 }
 0x247   :  { %v1326_v0 = vrot.slane %v1319_v59, %v2291_v34 }
 0x249   :  { %1020 = vrot.lane.b32.xlu1 %v1012_v29, %s2027_s13 }
 0x24a   :  { %1051 = vrot.lane.b32.xlu0 %v1048_v30, %s2031_s17 }
 0x24d   :  { %1078 = vrot.lane.b32.xlu1 %v1070_v33, %s2032_s18 }
 0x24e   :  { %1109 = vrot.lane.b32.xlu0 %v1106_v35, %s2033_s19 }
 0x251   :  { %1136 = vrot.lane.b32.xlu1 %v1128_v36, %s2034_s20 }
 0x252   :  { %1167 = vrot.lane.b32.xlu0 %v1164_v37, %s2038_s24 }
 0x255   :  { %1194 = vrot.lane.b32.xlu1 %v1186_v39, %s2026_s0 }
 0x256   :  { %1393 = vrot.lane.b32.xlu0 %v1390_v63, %s2036_s22 }
 0x259   :  { %1250 = vrot.lane.b32.xlu1 %v1242_v19, %s2030_s16 }
 0x25a   :  { %1224 = vrot.lane.b32.xlu0 %v1221_v17, %s2028_s14 }
 0x25d   :  { %1362 = vrot.lane.b32.xlu1 %v1354_v43, %s2035_s21 }
 0x25e   :  { %1280 = vrot.lane.b32.xlu0 %v1277_v42, %s2029_s15 }
 0x261   :  { %1306 = vrot.lane.b32.xlu1 %v1298_v49, %s2037_s23 }
 0x262   :  { %1222 = vrot.lane.b32.xlu0 %v1214_v48, %s2028_s14 }
 0x265   :  { %1420 = vrot.lane.b32.xlu1 %v1412_v53, %s2039_s25 }
 0x266   :  { %1278 = vrot.lane.b32.xlu0 %v1270_v52, %s2029_s15 }
 0x269   :  { %1391 = vrot.lane.b32.xlu1 %v1383_v58, %s2036_s22 }
 0x26a   :  { %1364 = vrot.lane.b32.xlu0 %v1361_v57, %s2035_s21 }
 0x26d   :  { %1196 = vrot.lane.b32.xlu1 %v1193_v1, %s2026_s0  ;;  %s1730_s0 = sshll.u32 %s2047_s12, 4  ;;  %s1731_s0 = int_to_ptr.vmem [resolvable:$true] %s1730_s0 }
 0x26e   :  { %1334 = vrot.lane.b32.xlu0 %v1326_v0, %s2023_s8  ;;  %s1995_s13 = scalar_lea.vmem %s1731_s0, 384  ;;  %p2000_p9 = scmp.lt.s32.totalorder %s1731_s0, %s1731_s0 }
 0x26f   :  { %p1996_p8 = scmp.ne.s32.totalorder %s1731_s0, %s1995_s13  ;;  %p2001_p10 = scmp.lt.s32.totalorder %s1995_s13, %s1995_s13 }
 0x271   :  { %1252 = vrot.lane.b32.xlu1 %v1249_v5, %s2030_s16  ;;  %p2002_p11 = por %p2001_p10, %p2000_p9 }
 0x272   :  { %1422 = vrot.lane.b32.xlu0 %v1419_v4, %s2039_s25 }
 0x273   :  { %p2003_p12 = pnand %p2002_p11, %p1996_p8 }
 0x275   :  { %1308 = vrot.lane.b32.xlu1 %v1305_v11, %s2037_s23 }
 0x276   :  { %1336 = vrot.lane.b32.xlu0 %v1333_v10, %s2023_s8 }
 0x279   :  { %1688 = vrot.lane.b32.xlu1 %v1683_v12, %s2037_s23 }
 0x27a   :  { %1690 = vrot.lane.b32.xlu0 %v1687_v13, %s2037_s23 }
 0x27d   :  { %1692 = vrot.lane.b32.xlu1 %v1684_v14, %s2037_s23 }
 0x27e   :  { %1658 = vrot.lane.b32.xlu0 %v1653_v16, %s2031_s17 }
 0x281   :  { %1660 = vrot.lane.b32.xlu1 %v1657_v18, %s2031_s17 }
 0x282   :  { %1662 = vrot.lane.b32.xlu0 %v1654_v45, %s2031_s17 }
 0x2a7   :  { %v992_v34 = vpop.permute.xlu1 %991 }
 0x2a8   :  { %v965_v20 = vpop.permute.xlu0 %964  ;;  %v995_v30 = vrot.slane %v992_v34, 4 }
 0x2a9   :  { %973 = vst.msk [vmem:[#allocation4 + $0x8] sm:$0xc] %vm91_vm1, %v965_v20  ;;  %v967_v31 = vrot.slane %v965_v20, 4 }
 0x2ab   :  { %v1050_v22 = vpop.permute.xlu1 %1049 }
 0x2ac   :  { %v1023_v23 = vpop.permute.xlu0 %1022  ;;  %v1053_v38 = vrot.slane %v1050_v22, 4 }
 0x2ad   :  { %1031 = vst.msk [vmem:[#allocation4 + $0x1c] sm:$0xc] %vm91_vm1, %v1023_v23  ;;  %v1025_v63 = vrot.slane %v1023_v23, 4 }
 0x2af   :  { %v1108_v24 = vpop.permute.xlu1 %1107 }
 0x2b0   :  { %v1081_v25 = vpop.permute.xlu0 %1080  ;;  %v1111_v43 = vrot.slane %v1108_v24, 4 }
 0x2b1   :  { %1089 = vst.msk [vmem:[#allocation4 + $0x30] sm:$0xc] %vm91_vm1, %v1081_v25  ;;  %v1083_v46 = vrot.slane %v1081_v25, 4 }
 0x2b3   :  { %v1166_v26 = vpop.permute.xlu1 %1165 }
 0x2b4   :  { %v1139_v27 = vpop.permute.xlu0 %1138  ;;  %v1169_v55 = vrot.slane %v1166_v26, 4 }
 0x2b5   :  { %1147 = vst.msk [vmem:[#allocation4 + $0x44] sm:$0xc] %vm91_vm1, %v1139_v27  ;;  %vm2538_vm1 = vcmask 900096   ;;  %v1141_v56 = vrot.slane %v1139_v27, 4 }
 0x2b7   :  { %v963_v28 = vpop.permute.xlu1 %962 }
 0x2b8   :  { %v994_v29 = vpop.permute.xlu0 %993  ;;  %v966_v32 = vrot.slane %v963_v28, 4 }
 0x2b9   :  { %v996_v33 = vrot.slane %v994_v29, 4  ;;  %1002 = vst.msk [vmem:[#allocation4 + $0x1c] sm:$0x3] %vm58_vm0, %v994_v29 }
 0x2ba   :  { %v968_v35 = vsel %vm84_vm2, %v966_v32, %v967_v31  ;;  %v2432_v32 = vld [vmem:[%s2507_s2] sm:$0x3]  ;;  %s2046_s2 = smov 96  }
 0x2bb   :  { %v997_v6 = vsel %vm84_vm2, %v995_v30, %v996_v33  ;;  %v969_v9 = vsel %vm86_vm10, %v963_v28, %v968_v35  ;;  %v1021_v37 = vpop.permute.xlu1 %1020  ;;  %vm2540_vm10 = vcmask 883712  }
 0x2bc   :  { %v998_v36 = vsel %vm2537_vm5, %v992_v34, %v997_v6  ;;  %v1052_v60 = vpop.permute.xlu0 %1051  ;;  %972 = vst [vmem:[#allocation4] sm:$0xcc] %v969_v9  ;;  %v1024_v39 = vrot.slane %v1021_v37, 4  ;;  %vm2549_vm5 = vmmov %vm2548_vm9 }
 0x2bd   :  { %1001 = vst [vmem:[#allocation4 + $0x14] sm:$0x33] %v998_v36  ;;  %v1054_v40 = vrot.slane %v1052_v60, 4  ;;  %1060 = vst.msk [vmem:[#allocation4 + $0x30] sm:$0x3] %vm58_vm0, %v1052_v60 }
 0x2be   :  { %v1026_v15 = vsel %vm84_vm2, %v1024_v39, %v1025_v63 }
 0x2bf   :  { %v1055_v17 = vsel %vm84_vm2, %v1053_v38, %v1054_v40  ;;  %v1027_v19 = vsel %vm2538_vm1, %v1021_v37, %v1026_v15  ;;  %v1079_v41 = vpop.permute.xlu1 %1078  ;;  %vm2550_vm1 = vcmask 293888  }
 0x2c0   :  { %v1056_v21 = vsel %vm2539_vm6, %v1050_v22, %v1055_v17  ;;  %v1110_v42 = vpop.permute.xlu0 %1109  ;;  %1030 = vst [vmem:[#allocation4 + $0x14] sm:$0xcc] %v1027_v19  ;;  %v1082_v47 = vrot.slane %v1079_v41, 4  ;;  %vm2551_vm6 = vcmask 113664  }
 0x2c1   :  { %1059 = vst [vmem:[#allocation4 + $0x28] sm:$0x33] %v1056_v21  ;;  %v1112_v48 = vrot.slane %v1110_v42, 4  ;;  %1118 = vst.msk [vmem:[#allocation4 + $0x44] sm:$0x3] %vm58_vm0, %v1110_v42 }
 0x2c2   :  { %v1084_v49 = vsel %vm84_vm2, %v1082_v47, %v1083_v46 }
 0x2c3   :  { %v1113_v50 = vsel %vm84_vm2, %v1111_v43, %v1112_v48  ;;  %v1085_v51 = vsel %vm2540_vm10, %v1079_v41, %v1084_v49  ;;  %v1137_v53 = vpop.permute.xlu1 %1136  ;;  %vm2552_vm10 = vmmov %vm2551_vm6 }
 0x2c4   :  { %v1114_v52 = vsel %vm2541_vm11, %v1108_v24, %v1113_v50  ;;  %v1168_v54 = vpop.permute.xlu0 %1167  ;;  %1088 = vst [vmem:[#allocation4 + $0x28] sm:$0xcc] %v1085_v51  ;;  %v1140_v57 = vrot.slane %v1137_v53, 4  ;;  %vm2553_vm11 = vmmov 0  }
 0x2c5   :  { %1117 = vst [vmem:[#allocation4 + $0x3c] sm:$0x33] %v1114_v52  ;;  %v1170_v58 = vrot.slane %v1168_v54, 4  ;;  %1176 = vst.msk [vmem:[#allocation4 + $0x58] sm:$0x3] %vm58_vm0, %v1168_v54  ;;  %vm2543_vm0 = vcmask 261120  }
 0x2c6   :  { %v1142_v59 = vsel %vm84_vm2, %v1140_v57, %v1141_v56 }
 0x2c7   :  { %v1171_v61 = vsel %vm84_vm2, %v1169_v55, %v1170_v58  ;;  %v1143_v0 = vsel %vm2542_vm14, %v1137_v53, %v1142_v59  ;;  %v2409_v2 = vpop.permute.xlu1 %1194  ;;  %v1952_v4 = vld [vmem:[#allocation4] ss:$20 sps:$4 sm:$0xff]   ;;  %v1954_v5 = vld [vmem:[#allocation4 + $0x4] ss:$20 sps:$4 sm:$0xff]   ;;  %vm2554_vm14 = vcmask 517120  }
 0x2c8   :  { %v1172_v1 = vsel %vm296_vm13, %v1166_v26, %v1171_v61  ;;  %v1394_v3 = vpop.permute.xlu0 %1393  ;;  %1146 = vst [vmem:[#allocation4 + $0x3c] sm:$0xcc] %v1143_v0  ;;  %v1198_v7 = vrot.slane %v2409_v2, 4  ;;  %1531 = vmatprep.subr.bf16.mxu1 %v1954_v5  ;;  %vm2544_vm13 = vcmask 244736  }
 0x2c9   :  { %1175 = vst [vmem:[#allocation4 + $0x50] sm:$0x33] %v1172_v1  ;;  %1402 = vst.msk [vmem:[#allocation4 + $0x4c] sm:$0xc] %vm367_vm4, %v1394_v3  ;;  %1532 = vmatpush1.bf16.msra.mxu1 %v1952_v4  ;;  %v1396_v38 = vrot.slane %v1394_v3, 4 }
 0x2ca   :  { %v1199_v10 = vsel %vm2543_vm0, %v1198_v7, %v2409_v2  ;;  %vm2555_vm0 = vcmask 1006592  }
 0x2cb   :  { %1203 = vst.msk [vmem:[#allocation4 + $0x8] sm:$0x33] %vm2164_vm7, %v1199_v10  ;;  %v2417_v11 = vpop.permute.xlu1 %1250 }
 0x2cc   :  { %v1225_v12 = vpop.permute.xlu0 %1224  ;;  %v1254_v13 = vrot.slane %v2417_v11, 4 }
 0x2ce   :  { %v1255_v14 = vsel %vm2544_vm13, %v1254_v13, %v2417_v11  ;;  %vm2556_vm13 = vcmask 1014784  }
 0x2cf   :  { %1259 = vst.msk [vmem:[#allocation4 + $0x1c] sm:$0x33] %vm2164_vm7, %v1255_v14  ;;  %v1363_v16 = vpop.permute.xlu1 %1362  ;;  %v1955_v45 = vld [vmem:[#allocation4 + $0x28] ss:$20 sps:$4 sm:$0xff]   ;;  %v1957_v34 = vld [vmem:[#allocation4 + $0x2c] ss:$20 sps:$4 sm:$0xff]  }
 0x2d0   :  { %v1281_v18 = vpop.permute.xlu0 %1280  ;;  %v1445_v20 = vld [vmem:[#allocation4 + $0x50] sm:$0x33]  ;;  %1533 = vmatprep.subr.bf16.mxu1 %v1957_v34  ;;  %v1366_v63 = vrot.slane %v1363_v16, 4 }
 0x2d1   :  { %v1812_v22 = vcombine.high %v1445_v20, %v1445_v20  ;;  %v1811_v23 = vcombine.low %v1445_v20, %v1445_v20  ;;  %1534 = vmatpush1.bf16.msra.mxu1 %v1955_v45 }
 0x2d3   :  { %v1307_v24 = vpop.permute.xlu1 %1306  ;;  %1816 = vmatprep.subr.msk.bf16.mxu1 %vm2545_vm15, %v1812_v22  ;;  %v1517_v28 = vsel %vm2546_vm3, %v1811_v23, 0  ;;  %vm2557_vm15 = vcmask 261120   ;;  %vm2558_vm3 = vmmov %vm2554_vm14 }
 0x2d4   :  { %v1223_v25 = vpop.permute.xlu0 %1222  ;;  %v1310_v26 = vrot.slane %v1307_v24, 4 }
 0x2d5   :  { %v1226_v27 = vrot.slane %v1223_v25, 4  ;;  %1536 = vmatpush1.bf16.msra.mxu1 %v1517_v28 }
 0x2d6   :  { %v1311_v29 = vsel %vm2547_vm8, %v1310_v26, %v1307_v24  ;;  %1875 = vmatprep.subr.bf16.mxu1 %v2041_v44  ;;  %vm2559_vm8 = vcmask 97280  }
 0x2d7   :  { %v1227_v30 = vsel %vm2548_vm9, %v1226_v27, %v1223_v25  ;;  %v1228_v31 = vsel %vm2549_vm5, %v1226_v27, %v1225_v12  ;;  %1315 = vst.msk [vmem:[#allocation4 + $0x30] sm:$0x33] %vm2164_vm7, %v1311_v29  ;;  %v1421_v33 = vpop.permute.xlu1 %1420  ;;  %vm2560_vm9 = vcmask 244736   ;;  %vm2561_vm5 = vmmov %vm2558_vm3 }
 0x2d8   :  { %1231 = vst.msk [vmem:[#allocation4 + $0x8] sm:$0xcc] %vm2180_vm12, %v1227_v30  ;;  %v1279_v35 = vpop.permute.xlu0 %1278  ;;  %1817 = vmatmul.mubr.msk.bf16.vlgmr.msra.gmra.mrb[4].mxu1 %vm2550_vm1, %v2432_v32  ;;  %v1424_v52 = vrot.slane %v1421_v33, 4  ;;  %vm2562_vm1 = vmmov %vm2558_vm3 }
 0x2d9   :  { %1232 = vst.msk [vmem:[#allocation4 + $0x10] sm:$0xc] %vm367_vm4, %v1228_v31  ;;  %v1282_v6 = vrot.slane %v1279_v35, 4  ;;  %1881 = vmatprep.mubr.msk.bf16.mxu1 %vm2553_vm11, %v2041_v44  ;;  %vm2566_vm11 = vmmov %vm2562_vm1 }
 0x2db   :  { %v1283_v9 = vsel %vm2551_vm6, %v1282_v6, %v1279_v35  ;;  %v1284_v36 = vsel %vm2552_vm10, %v1282_v6, %v1281_v18  ;;  %v1392_v37 = vpop.permute.xlu1 %1391  ;;  %vm2563_vm6 = vcmask 998400   ;;  %vm2565_vm10 = vmmov %vm2559_vm8 }
 0x2dc   :  { %1287 = vst.msk [vmem:[#allocation4 + $0x1c] sm:$0xcc] %vm2180_vm12, %v1283_v9  ;;  %v1365_v60 = vpop.permute.xlu0 %1364  ;;  %v1395_v39 = vrot.slane %v1392_v37, 4 }
 0x2dd   :  { %1288 = vst.msk [vmem:[#allocation4 + $0x24] sm:$0xc] %vm367_vm4, %v1284_v36  ;;  %v1367_v40 = vrot.slane %v1365_v60, 4 }
 0x2de   :  { %1373 = vst.msk [vmem:[#allocation4 + $0x4c] sm:$0x3] %vm2554_vm14, %v1365_v60  ;;  %v1397_v15 = vsel %vm84_vm2, %v1395_v39, %v1396_v38 }
 0x2df   :  { %v1368_v17 = vsel %vm84_vm2, %v1366_v63, %v1367_v40  ;;  %v1398_v19 = vsel %vm2555_vm0, %v1392_v37, %v1397_v15  ;;  %v1197_v41 = vpop.permute.xlu1 %1196  ;;  %vm2570_vm0 = vcmask 293888  }
 0x2e0   :  { %v1369_v21 = vsel %vm2556_vm13, %v1363_v16, %v1368_v17  ;;  %v1335_v42 = vpop.permute.xlu0 %1334  ;;  %1401 = vst.msk [vmem:[#allocation4 + $0x44] sm:$0xcc] %vm2180_vm12, %v1398_v19  ;;  %v1200_v43 = vsel %vm2557_vm15, %v1198_v7, %v1197_v41  ;;  %vm2571_vm13 = vmmov %vm2570_vm0  ;;  %vm2572_vm15 = vcmask 891904  }
 0x2e1   :  { %1372 = vst.msk [vmem:[#allocation4 + $0x44] sm:$0x33] %vm2164_vm7, %v1369_v21  ;;  %v1338_v46 = vrot.slane %v1335_v42, 4 }
 0x2e2   :  { %1204 = vst.msk [vmem:[#allocation4 + $0x10] sm:$0x3] %vm2558_vm3, %v1200_v43  ;;  %vm2573_vm3 = vmmov %vm2572_vm15 }
 0x2e3   :  { %v1339_v47 = vsel %vm2559_vm8, %v1338_v46, %v1335_v42  ;;  %v1960_v48 = vld [vmem:[#allocation4 + $0x8] ss:$20 sps:$4 sm:$0xff]   ;;  %v1962_v49 = vld [vmem:[#allocation4 + $0xc] ss:$20 sps:$4 sm:$0xff]   ;;  %v1253_v50 = vpop.permute.xlu1 %1252 }
 0x2e4   :  { %1343 = vst.msk [vmem:[#allocation4 + $0x30] sm:$0xcc] %vm2180_vm12, %v1339_v47  ;;  %v1423_v51 = vpop.permute.xlu0 %1422  ;;  %v1256_v53 = vsel %vm2560_vm9, %v1254_v13, %v1253_v50  ;;  %1572 = vmatprep.subr.bf16.mxu0 %v1962_v49  ;;  %vm2564_vm12 = vcmask 105472   ;;  %vm1681_vm9 = vcmask 257024  }
 0x2e5   :  { %v1425_v54 = vrot.slane %v1423_v51, 4  ;;  %1431 = vst.msk [vmem:[#allocation4 + $0x60] sm:$0x3] %vm2561_vm5, %v1423_v51  ;;  %1573 = vmatpush1.bf16.msra.mxu0 %v1960_v48  ;;  %vm2574_vm8 = vmmov %vm2564_vm12 }
 0x2e6   :  { %1260 = vst.msk [vmem:[#allocation4 + $0x24] sm:$0x3] %vm2562_vm1, %v1256_v53  ;;  %vm2575_vm5 = vmmov %vm2574_vm8  ;;  %vm1718_vm1 = vcmask 785408  }
 0x2e7   :  { %v1426_v55 = vsel %vm84_vm2, %v1424_v52, %v1425_v54  ;;  %v1309_v57 = vpop.permute.xlu1 %1308 }
 0x2e8   :  { %v1427_v56 = vsel %vm2563_vm6, %v1421_v33, %v1426_v55  ;;  %v1337_v58 = vpop.permute.xlu0 %1336  ;;  %v1312_v8 = vsel %vm2564_vm12, %v1310_v26, %v1309_v57 }
 0x2e9   :  { %1430 = vst.msk [vmem:[#allocation4 + $0x58] sm:$0x33] %vm2164_vm7, %v1427_v56  ;;  %v1340_v59 = vsel %vm2565_vm10, %v1338_v46, %v1337_v58  ;;  %vm2567_vm7 = vcmask 1041408  }
 0x2ea   :  { %1316 = vst.msk [vmem:[#allocation4 + $0x38] sm:$0x3] %vm2566_vm11, %v1312_v8  ;;  %vm2568_vm14 = vmmov %vm2567_vm7 }
 0x2eb   :  { %1344 = vst.msk [vmem:[#allocation4 + $0x38] sm:$0xc] %vm367_vm4, %v1340_v59  ;;  %v1963_v61 = vld [vmem:[#allocation4 + $0x30] ss:$20 sps:$4 sm:$0xff]   ;;  %v1965_v0 = vld [vmem:[#allocation4 + $0x34] ss:$20 sps:$4 sm:$0xff]   ;;  %vm2569_vm4 = vmmov %vm2567_vm7  ;;  %v1689_v11 = vpop.permute.xlu1 %1688 }
 0x2ec   :  { %1574 = vmatprep.subr.bf16.mxu0 %v1965_v0  ;;  %v1970_v5 = vld [vmem:[#allocation4 + $0x60] ss:$0 sps:$4 sm:$0x33]   ;;  %v1691_v12 = vpop.permute.xlu0 %1690 }
 0x2ed   :  { %v1966_v1 = vld [vmem:[#allocation4 + $0x10] ss:$20 sps:$4 sm:$0xff]   ;;  %1575 = vmatpush1.bf16.msra.mxu0 %v1963_v61  ;;  %v1529_v10 = vsel %vm2569_vm4, %v1970_v5, 0  ;;  %v1695_v33 = vsel %vm2574_vm8, %v1689_v11, %v1691_v12 }
 0x2ee   :  { %1876 = vmatpush3.bf16.msra.mxu1 %v1966_v1 }
 0x2ef   :  { %1877 = vmatprep.subr.bf16.mxu1 %v2041_v44  ;;  %v1693_v13 = vpop.permute.xlu1 %1692 }
 0x2f0   :  { %v1446_v2 = vld [vmem:[#allocation4 + $0x58] sm:$0x33]  ;;  %v1659_v14 = vpop.permute.xlu0 %1658  ;;  %v1696_v38 = vsel %vm2575_vm5, %v1691_v12, %v1693_v13 }
 0x2f1   :  { %v1814_v3 = vcombine.high %v1446_v2, %v1446_v2  ;;  %v1813_v62 = vcombine.low %v1446_v2, %v1446_v2 }
 0x2f2   :  { %v1969_v4 = vld [vmem:[#allocation4 + $0x38] ss:$20 sps:$4 sm:$0xff]  }
 0x2f3   :  { %1818 = vmatprep.subr.msk.bf16.mxu0 %vm2567_vm7, %v1814_v3  ;;  %v1523_v7 = vsel %vm2568_vm14, %v1813_v62, 0  ;;  %1878 = vmatpush3.bf16.msra.mxu1 %v1969_v4  ;;  %v1661_v16 = vpop.permute.xlu1 %1660 }
 0x2f4   :  { %1577 = vmatpush1.bf16.msra.mxu0 %v1523_v7  ;;  %1879 = vmatprep.subr.bf16.mxu1 %v2041_v44  ;;  %v1663_v18 = vpop.permute.xlu0 %1662  ;;  %v1665_v45 = vsel %vm2572_vm15, %v1659_v14, %v1661_v16 }
 0x2f5   :  { %v1666_v34 = vsel %vm2573_vm3, %v1661_v16, %v1663_v18 }
 0x2f7   :  { %1819 = vmatmul.mubr.msk.bf16.vlgmr.msra.gmra.mrb[8].mxu0 %vm2570_vm0, %v2432_v32  ;;  %1880 = vmatpush3.bf16.msra.mxu1 %v1529_v10 }
 0x2fa   :  { %1882 = vmatmul.mubr.msk.bf16.vlgmr.msra.gmra.mrb[8].mxu1 %vm2571_vm13, %v2432_v32 }
 0x3ab   :  { %v1565_v44 = vpop.f32.mrb[4].mxu1 }
 0x3ac   :  { %v1567_v20 = vpop.f32.mrb[5].mxu1  ;;  %v1670_v22 = vadd.f32 %v1665_v45, %v1565_v44 }
 0x3ad   :  { %v1569_v23 = vpop.f32.mrb[6].mxu1  ;;  %v1671_v24 = vadd.f32 %v1666_v34, %v1567_v20 }
 0x3ae   :  { %v1673_v25 = vmax.f32 %v1670_v22, 0.0  ;;  %v1570_v26 = vpop.f32.mrb[7].mxu1 }
 0x3af   :  { %v1674_v27 = vmax.f32 %v1671_v24, 0.0 }
 0x3b1   :  { %v1678_v28 = vcombine.low %v1673_v25, %v1674_v27 }
 0x3b3   :  { %1680 = vst [vmem:[#allocation8] sm:$0xff] %v1678_v28 }
 0x3ca   :  { %v1606_v29 = vpop.f32.mrb[8].mxu0 }
 0x3cb   :  { %v1672_v30 = vadd.f32 %v1663_v18, %v1606_v29  ;;  %v1700_v31 = vadd.f32 %v1689_v11, %v1606_v29  ;;  %v1608_v32 = vpop.f32.mrb[9].mxu0 }
 0x3cc   :  { %v1701_v35 = vadd.f32 %v1695_v33, %v1608_v32  ;;  %v1610_v6 = vpop.f32.mrb[10].mxu0 }
 0x3cd   :  { %v1675_v9 = vmax.f32 %v1672_v30, 0.0  ;;  %v1703_v36 = vmax.f32 %v1700_v31, 0.0  ;;  %v1611_v37 = vpop.f32.mrb[11].mxu0  ;;  %v1647_v60 = vpop.f32.mrb[8].mxu1 }
 0x3ce   :  { %v1704_v63 = vmax.f32 %v1701_v35, 0.0  ;;  %v1702_v39 = vadd.f32 %v1696_v38, %v1647_v60  ;;  %v1883_v40 = vpop.f32.mrb[9].mxu1 }
 0x3cf   :  { %v1650_v15 = vpop.f32.mrb[10].mxu1  ;;  %1682 = vst.msk [vmem:[#allocation8 + $0x8] sm:$0xf] %vm1681_vm9, %v1675_v9 }
 0x3d0   :  { %v1709_v17 = vcombine.low %v1703_v36, %v1704_v63  ;;  %v1705_v19 = vmax.f32 %v1702_v39, 0.0  ;;  %v1884_v21 = vpop.f32.mrb[11].mxu1 }
 0x3d2   :  { %1710 = vrot.lane.b32.xlu1 %v1709_v17, %s2046_s2  ;;  %1712 = vrot.lane.b32.xlu0 %v1705_v19, %s2046_s2 }
 0x444   :  { %v1711_v41 = vpop.permute.xlu1 %1710  ;;  %v1713_v42 = vpop.permute.xlu0 %1712 }
 0x445   :  { %v1714_v43 = vrot.slane %v1711_v41, 4  ;;  %v1715_v46 = vrot.slane %v1713_v42, 4  ;;  %1724 = vst.msk [vmem:[#allocation8 + $0x14] sm:$0xf] %vm1681_vm9, %v1713_v42 }
 0x447   :  { %v1717_v47 = vsel %vm84_vm2, %v1714_v43, %v1715_v46 }
 0x448   :  { %v1719_v48 = vsel %vm1718_vm1, %v1711_v41, %v1717_v47 }
 0x449   :  { %1723 = vst [vmem:[#allocation8 + $0xc] sm:$0xff] %v1719_v48 }
 0x44a   :  { %2006 = shalt.err (!%p2003_p12)
}
 0x44b   :  { %s2007_s16 = scalar_lea.hbm %s2511_s6, 384 }
 0x44c   :  { %p2008_p13 = scmp.ne.s32.totalorder %s2511_s6, %s2007_s16  ;;  %p2011_p0 = scmp.lt.u32.totalorder %s2007_s16, %s2511_s6 }
 0x44e   :  { %p2013_p1 = pnand %p2011_p0, %p2008_p13 }
 0x450   :  { %2016 = shalt.err (!%p2013_p1)
}
 0x451   :  { %1736 = dma.vmem_to_hbm [thread:$0]  %s1731_s0, 384, %s2511_s6, [#allocation7], %s2022_s7, %s2022_s7, %s2023_s8  }
 0x452   :  { %2019 = dma.done.wait [#allocation7], 384  }
 0x453   :  { %2020 = vsyncadd [#allocation7], 4294966912 }
 0x454   :  { %1740 = vsyncpa [#allocation6], 1 }
 0x455   :  { %1741 = vsyncpa [#allocation7], 1 }

</bundles_post_ra>
